<compile_context>
chip_gen: v6e
topology: v6e:2x2x1
jax: 0.10.0
libtpu: 0.0.40
codegen_flags: <defaults>
</compile_context>

<pallas_src>
import functools
import math

import jax
import jax.numpy as jnp
from jax.experimental import pallas as pl
from jax.experimental.pallas import tpu as pltpu


# ----------------------------- kernel ----------------------------------------


def _layer_norm(z, gamma, beta, eps):
    mean = jnp.mean(z, axis=-1, keepdims=True)
    var = jnp.mean((z - mean) ** 2, axis=-1, keepdims=True)  # biased var (PyTorch)
    return (z - mean) * jax.lax.rsqrt(var + eps) * gamma + beta


def fused_encoder_kernel(
    x_ref,                                    # (M, D)  f32   (read only at l == 0)
    wqkv_ref, bqkv_ref,                       # (D, 3D) bf16, (1, 3D) f32
    wo_ref, bo_ref,                           # (D, D)  bf16, (1, D)  f32
    g1_ref, be1_ref,                          # (1, D)  f32
    w1_ref, b1_ref,                           # (D, FF) bf16, (1, FF) f32
    w2_ref, b2_ref,                           # (FF, D) bf16, (1, D)  f32
    g2_ref, be2_ref,                          # (1, D)  f32
    o_ref,                                    # (M, D)  f32 — output AND residual carry
    *, num_heads, seq_len, block_batch, eps,
):
    """One encoder layer for one batch block; grid = (batch_blocks, layers)."""
    l = pl.program_id(1)

    # Load the input into the layer-resident carry at the first layer only.
    @pl.when(l == 0)
    def _():
        o_ref[...] = x_ref[...]

    x = o_ref[...]                            # (M, D) f32 residual stream
    M, D = x.shape
    H = num_heads
    Dh = D // H
    S = seq_len
    Bt = block_batch
    cdt = wqkv_ref.dtype                      # matmul compute dtype (bf16)

    # ---- multi-head self-attention ------------------------------------------
    # Fused QKV projection: one MXU push. 1/sqrt(Dh) is folded into the q
    # columns/bias on the host, so no post-matmul scale is needed.
    xc = x.astype(cdt)
    qkv = jnp.dot(xc, wqkv_ref[...], preferred_element_type=jnp.float32)
    qkv = (qkv + bqkv_ref[...]).astype(cdt)   # (M, 3D); cast once for score/ctx matmuls

    ctx_heads = []
    for h in range(H):                        # H tiny score/ctx matmuls — inherent to MHA (Dh small)
        qh = qkv[:, h * Dh:(h + 1) * Dh].reshape(Bt, S, Dh)
        kh = qkv[:, D + h * Dh:D + (h + 1) * Dh].reshape(Bt, S, Dh)
        vh = qkv[:, 2 * D + h * Dh:2 * D + (h + 1) * Dh].reshape(Bt, S, Dh)

        s = jnp.einsum('bqf,bkf->bqk', qh, kh,
                       preferred_element_type=jnp.float32)           # (Bt, S, S)
        s = s - jnp.max(s, axis=-1, keepdims=True)
        p = jnp.exp(s)
        p = p * pl.reciprocal(jnp.sum(p, axis=-1, keepdims=True), approx=True)

        ctx_h = jnp.einsum('bqk,bkf->bqf', p.astype(cdt), vh,
                           preferred_element_type=jnp.float32)       # (Bt, S, Dh)
        ctx_heads.append(ctx_h.reshape(M, Dh))

    ctx = jnp.concatenate(ctx_heads, axis=-1).astype(cdt)            # (M, D)

    # Output projection: single (M, D) x (D, D) matmul.
    attn = jnp.dot(ctx, wo_ref[...],
                   preferred_element_type=jnp.float32) + bo_ref[...]

    # ---- add & norm 1 ---------------------------------------------------------
    h1 = _layer_norm(x + attn, g1_ref[...], be1_ref[...], eps)       # f32 (M, D)

    # ---- feed-forward: linear2(relu(linear1(h1))) -----------------------------
    hid = jnp.dot(h1.astype(cdt), w1_ref[...],
                  preferred_element_type=jnp.float32) + b1_ref[...]  # (M, FF)
    hid = jnp.maximum(hid, 0.0)
    ff = jnp.dot(hid.astype(cdt), w2_ref[...],
                 preferred_element_type=jnp.float32) + b2_ref[...]   # (M, D)

    # ---- add & norm 2: write back into the carry (final layer's value is the
    # output block that gets DMA'd to HBM) --------------------------------------
    o_ref[...] = _layer_norm(h1 + ff, g2_ref[...], be2_ref[...], eps)


# ----------------------------- wrapper ----------------------------------------


_WEIGHT_NAMES = ("wqkv", "bqkv", "wo", "bo", "g1", "be1",
                 "w1", "b1", "w2", "b2", "g2", "be2")


def transformer_encoder(src, params, num_heads, eps=1e-5, block_batch=None,
                        vmem_limit_bytes=None):
    """src: (S, B, D) f32 — PyTorch batch_first=False convention.

    params: dict of L-stacked kernel-layout weights (see prepare_params).
    """
    S, B, D = src.shape
    L = params["wqkv"].shape[0]

    if block_batch is None:
        # >= 2 grid steps on the parallel axis (v7x has 2 TCs), as large an M
        # (= block_batch * S) per step as that allows.
        block_batch = B // 2 if (B >= 2 and B % 2 == 0) else B
    assert B % block_batch == 0
    nb = B // block_batch
    M = block_batch * S
    assert M % 8 == 0, "block rows must be a multiple of the 8-sublane tile"

    # One layout op per forward: (S, B, D) -> batch-major rows (B*S, D).
    x = jnp.transpose(src, (1, 0, 2)).reshape(B * S, D)

    weight_args = [params[n] for n in _WEIGHT_NAMES]

    def wspec(a):
        # Layer-stacked weight: leading L dim squeezed, rest full-block.
        # (These blocks change with l, so default double-buffering overlaps
        # the next layer's weight DMA with the current layer's compute.)
        return pl.BlockSpec((None,) + a.shape[1:], lambda b, l: (l, 0, 0))

    kernel = functools.partial(fused_encoder_kernel, num_heads=num_heads,
                               seq_len=S, block_batch=block_batch, eps=eps)

    out = pl.pallas_call(
        kernel,
        out_shape=jax.ShapeDtypeStruct((B * S, D), src.dtype),
        grid=(nb, L),
        in_specs=[pl.BlockSpec((M, D), lambda b, l: (b, 0))]
        + [wspec(a) for a in weight_args],
        out_specs=pl.BlockSpec((M, D), lambda b, l: (b, 0)),
        compiler_params=pltpu.CompilerParams(
            dimension_semantics=("parallel", "arbitrary"),
            vmem_limit_bytes=vmem_limit_bytes),  # set when scaling D/FF (v7x: 64 MiB VMEM)
    )(x, *weight_args)

    return out.reshape(B, S, D).transpose(1, 0, 2)  # back to (S, B, D)


# --------------------- params (PyTorch layout -> kernel layout) ---------------


def prepare_params(torch_layers, num_heads, compute_dtype=jnp.bfloat16):
    """Convert a list of per-layer PyTorch-layout params to stacked kernel layout.

    MXU weights are pre-transposed and cast to compute_dtype (bf16); biases and
    LayerNorm params stay f32. 1/sqrt(head_dim) is folded into the q projection.
    Use compute_dtype=jnp.float32 for tighter parity with the f32 reference.
    """
    per_layer = []
    for p in torch_layers:
        D = p["in_proj_weight"].shape[1]
        FF = p["linear1_weight"].shape[0]
        Dh = D // num_heads
        scale = 1.0 / math.sqrt(Dh)

        w_in = p["in_proj_weight"]                      # (3D, D), rows = [q; k; v]
        b_in = p["in_proj_bias"]                        # (3D,)
        qscale = jnp.concatenate([jnp.full((D,), scale, jnp.float32),
                                  jnp.ones((2 * D,), jnp.float32)])
        wqkv = jnp.transpose(w_in * qscale[:, None]).astype(compute_dtype)   # (D, 3D)
        bqkv = (b_in * qscale).reshape(1, 3 * D).astype(jnp.float32)

        per_layer.append(dict(
            wqkv=wqkv, bqkv=bqkv,
            wo=jnp.transpose(p["out_proj_weight"]).astype(compute_dtype),    # (D, D)
            bo=p["out_proj_bias"].reshape(1, D).astype(jnp.float32),
            g1=p["norm1_weight"].reshape(1, D).astype(jnp.float32),
            be1=p["norm1_bias"].reshape(1, D).astype(jnp.float32),
            w1=jnp.transpose(p["linear1_weight"]).astype(compute_dtype),     # (D, FF)
            b1=p["linear1_bias"].reshape(1, FF).astype(jnp.float32),
            w2=jnp.transpose(p["linear2_weight"]).astype(compute_dtype),     # (FF, D)
            b2=p["linear2_bias"].reshape(1, D).astype(jnp.float32),
            g2=p["norm2_weight"].reshape(1, D).astype(jnp.float32),
            be2=p["norm2_bias"].reshape(1, D).astype(jnp.float32),
        ))
    # Stack with a leading layer axis so a single pallas_call covers all layers.
    return {k: jnp.stack([lp[k] for lp in per_layer], axis=0) for k in _WEIGHT_NAMES}


def init_torch_params(key, embed_dim, num_heads, num_layers, dim_feedforward=2048):
    """PyTorch-style initialization, PyTorch tensor layout (f32)."""
    D, FF = embed_dim, dim_feedforward
    layers = []
    for layer in range(num_layers):
        ks = jax.random.split(jax.random.fold_in(key, layer), 7)

        def lin(kw, kb, out_f, in_f):
            bound = 1.0 / math.sqrt(in_f)
            w = jax.random.uniform(kw, (out_f, in_f), jnp.float32, -bound, bound)
            b = jax.random.uniform(kb, (out_f,), jnp.float32, -bound, bound)
            return w, b

        # in_proj: xavier_uniform weight, zero bias (nn.MultiheadAttention default)
        bound_in = math.sqrt(6.0 / (3 * D + D))
        in_w = jax.random.uniform(ks[0], (3 * D, D), jnp.float32, -bound_in, bound_in)
        in_b = jnp.zeros((3 * D,), jnp.float32)
        out_w, out_b = lin(ks[1], ks[2], D, D)
        w1, b1 = lin(ks[3], ks[4], FF, D)
        w2, b2 = lin(ks[5], ks[6], D, FF)

        layers.append(dict(
            in_proj_weight=in_w, in_proj_bias=in_b,
            out_proj_weight=out_w, out_proj_bias=out_b,
            linear1_weight=w1, linear1_bias=b1,
            linear2_weight=w2, linear2_bias=b2,
            norm1_weight=jnp.ones((D,), jnp.float32),
            norm1_bias=jnp.zeros((D,), jnp.float32),
            norm2_weight=jnp.ones((D,), jnp.float32),
            norm2_bias=jnp.zeros((D,), jnp.float32),
        ))
    return layers


# --------------------------- pure-JAX reference --------------------------------


def reference_forward(src, torch_layers, num_heads, eps=1e-5):
    S, B, D = src.shape
    H = num_heads
    Dh = D // H

    def ln(z, g, b):
        m = z.mean(-1, keepdims=True)
        v = ((z - m) ** 2).mean(-1, keepdims=True)
        return (z - m) / jnp.sqrt(v + eps) * g + b

    x = jnp.transpose(src, (1, 0, 2))                       # (B, S, D)
    for p in torch_layers:
        qkv = x @ p["in_proj_weight"].T + p["in_proj_bias"]
        q, k, v = qkv[..., :D], qkv[..., D:2 * D], qkv[..., 2 * D:]
        q = q * (Dh ** -0.5)

        def heads(t):
            return t.reshape(B, S, H, Dh).transpose(0, 2, 1, 3)

        sc = jnp.einsum('bhqd,bhkd->bhqk', heads(q), heads(k))
        pr = jax.nn.softmax(sc, axis=-1)
        ctx = jnp.einsum('bhqk,bhkd->bhqd', pr, heads(v))
        ctx = ctx.transpose(0, 2, 1, 3).reshape(B, S, D)
        attn = ctx @ p["out_proj_weight"].T + p["out_proj_bias"]

        h1 = ln(x + attn, p["norm1_weight"], p["norm1_bias"])
        hid = jnp.maximum(h1 @ p["linear1_weight"].T + p["linear1_bias"], 0.0)
        ff = hid @ p["linear2_weight"].T + p["linear2_bias"]
        x = ln(h1 + ff, p["norm2_weight"], p["norm2_bias"])
    return jnp.transpose(x, (1, 0, 2))


# ------------------------------- main ------------------------------------------


if __name__ == "__main__":
    embed_dim = 32
    num_heads = 4
    num_layers = 2
    seq_len = 8
    batch = 2

    key = jax.random.PRNGKey(0)
    k_src, k_params = jax.random.split(key)

    src = jax.random.normal(k_src, (seq_len, batch, embed_dim), jnp.float32)
    torch_layers = init_torch_params(k_params, embed_dim, num_heads, num_layers)
    params = prepare_params(torch_layers, num_heads)

    out = transformer_encoder(src, params, num_heads)
    out = jax.block_until_ready(out)

    assert out.shape == (seq_len, batch, embed_dim)
    assert bool(jnp.all(jnp.isfinite(out)))

    ref = reference_forward(src, torch_layers, num_heads)
    err = float(jnp.max(jnp.abs(out - ref)))
    # bf16 weights + approx softmax reciprocal => not bit-exact vs f32 reference.
    assert err < 0.25, f"max abs err vs reference too large: {err}"

    print("KERNEL_OK")
</pallas_src>

<mosaic_0001>
module attributes {stable_mosaic.version = 11 : i64} {
  func.func @fused_encoder_kernel(%arg0: i32, %arg1: i32, %arg2: memref<8x32xf32, #tpu.memory_space<vmem>>, %arg3: memref<1x32x96xbf16, #tpu.memory_space<vmem>>, %arg4: memref<1x1x96xf32, #tpu.memory_space<vmem>>, %arg5: memref<1x32x32xbf16, #tpu.memory_space<vmem>>, %arg6: memref<1x1x32xf32, #tpu.memory_space<vmem>>, %arg7: memref<1x1x32xf32, #tpu.memory_space<vmem>>, %arg8: memref<1x1x32xf32, #tpu.memory_space<vmem>>, %arg9: memref<1x32x2048xbf16, #tpu.memory_space<vmem>>, %arg10: memref<1x1x2048xf32, #tpu.memory_space<vmem>>, %arg11: memref<1x2048x32xbf16, #tpu.memory_space<vmem>>, %arg12: memref<1x1x32xf32, #tpu.memory_space<vmem>>, %arg13: memref<1x1x32xf32, #tpu.memory_space<vmem>>, %arg14: memref<1x1x32xf32, #tpu.memory_space<vmem>>, %arg15: memref<8x32xf32, #tpu.memory_space<vmem>>) attributes {dimension_semantics = [#tpu.dimension_semantics<parallel>, #tpu.dimension_semantics<arbitrary>], iteration_bounds = array<i64: 2, 2>, scalar_prefetch = 0 : i64, scratch_operands = 0 : i64, tpu.core_type = #tpu.core_type<tc>, window_params = [{transform_indices = @transform_0, window_bounds = array<i64: 8, 32>}, {transform_indices = @transform_1, window_bounds = array<i64: 1, 32, 96>}, {transform_indices = @transform_2, window_bounds = array<i64: 1, 1, 96>}, {transform_indices = @transform_3, window_bounds = array<i64: 1, 32, 32>}, {transform_indices = @transform_4, window_bounds = array<i64: 1, 1, 32>}, {transform_indices = @transform_5, window_bounds = array<i64: 1, 1, 32>}, {transform_indices = @transform_6, window_bounds = array<i64: 1, 1, 32>}, {transform_indices = @transform_7, window_bounds = array<i64: 1, 32, 2048>}, {transform_indices = @transform_8, window_bounds = array<i64: 1, 1, 2048>}, {transform_indices = @transform_9, window_bounds = array<i64: 1, 2048, 32>}, {transform_indices = @transform_10, window_bounds = array<i64: 1, 1, 32>}, {transform_indices = @transform_11, window_bounds = array<i64: 1, 1, 32>}, {transform_indices = @transform_12, window_bounds = array<i64: 1, 1, 32>}, {transform_indices = @transform_13, window_bounds = array<i64: 8, 32>}]} {
    %c0_i32 = arith.constant 0 : i32
    %0 = arith.cmpi eq, %arg1, %c0_i32 : i32
    %1 = arith.extui %0 : i1 to i32
    %c0_i32_0 = arith.constant 0 : i32
    %2 = arith.cmpi ne, %1, %c0_i32_0 : i32
    scf.if %2 {
      %c0_70 = arith.constant 0 : index
      %c0_71 = arith.constant 0 : index
      %175 = vector.load %arg2[%c0_70, %c0_71] : memref<8x32xf32, #tpu.memory_space<vmem>>, vector<8x32xf32>
      %c0_72 = arith.constant 0 : index
      %c0_73 = arith.constant 0 : index
      %176 = vector.load %arg15[%c0_72, %c0_73] : memref<8x32xf32, #tpu.memory_space<vmem>>, vector<8x32xf32>
      tpu.vector_store %arg15[%c0_72, %c0_73], %175 {strides = array<i32>} : memref<8x32xf32, #tpu.memory_space<vmem>>, vector<8x32xf32>,
    } else {
    }
    %c0 = arith.constant 0 : index
    %c0_1 = arith.constant 0 : index
    %3 = vector.load %arg15[%c0, %c0_1] : memref<8x32xf32, #tpu.memory_space<vmem>>, vector<8x32xf32>
    %4 = arith.truncf %3 : vector<8x32xf32> to vector<8x32xbf16>
    %c0_2 = arith.constant 0 : index
    %c0_3 = arith.constant 0 : index
    %c0_4 = arith.constant 0 : index
    %5 = vector.load %arg3[%c0_2, %c0_3, %c0_4] : memref<1x32x96xbf16, #tpu.memory_space<vmem>>, vector<1x32x96xbf16>
    %6 = vector.shape_cast %5 : vector<1x32x96xbf16> to vector<32x96xbf16>
    %cst = arith.constant dense<0.000000e+00> : vector<8x96xf32>
    %7 = tpu.matmul %4, %6, %cst {dimension_numbers = #tpu.dot_dimension_numbers<[1], [0], [0], [1], [0, 0, 1, 1], [], []>} : vector<8x32xbf16>, vector<32x96xbf16>, vector<8x96xf32> -> vector<8x96xf32>
    %c0_5 = arith.constant 0 : index
    %c0_6 = arith.constant 0 : index
    %c0_7 = arith.constant 0 : index
    %8 = vector.load %arg4[%c0_5, %c0_6, %c0_7] : memref<1x1x96xf32, #tpu.memory_space<vmem>>, vector<1x1x96xf32>
    %9 = vector.shape_cast %8 : vector<1x1x96xf32> to vector<1x96xf32>
    %10 = vector.broadcast %9 : vector<1x96xf32> to vector<8x96xf32>
    %11 = arith.addf %7, %10 : vector<8x96xf32>
    %12 = arith.truncf %11 : vector<8x96xf32> to vector<8x96xbf16>
    %13 = vector.extract_strided_slice %12 {offsets = [0, 0], sizes = [8, 8], strides = [1, 1]} : vector<8x96xbf16> to vector<8x8xbf16>
    %14 = vector.shape_cast %13 : vector<8x8xbf16> to vector<1x8x8xbf16>
    %15 = vector.extract_strided_slice %12 {offsets = [0, 32], sizes = [8, 8], strides = [1, 1]} : vector<8x96xbf16> to vector<8x8xbf16>
    %16 = vector.shape_cast %15 : vector<8x8xbf16> to vector<1x8x8xbf16>
    %17 = vector.extract_strided_slice %12 {offsets = [0, 64], sizes = [8, 8], strides = [1, 1]} : vector<8x96xbf16> to vector<8x8xbf16>
    %18 = vector.shape_cast %17 : vector<8x8xbf16> to vector<1x8x8xbf16>
    "tpu.trace_start"() <{level = 10 : i32, message = "bqf,bkf->bqk"}> : () -> ()
    %cst_8 = arith.constant dense<0.000000e+00> : vector<1x8x8xf32>
    %19 = tpu.matmul %14, %16, %cst_8 {dimension_numbers = #tpu.dot_dimension_numbers<[2], [2], [1], [1], [0, 0, 0, 1, 1, 1], [0], [0]>} : vector<1x8x8xbf16>, vector<1x8x8xbf16>, vector<1x8x8xf32> -> vector<1x8x8xf32>
    "tpu.trace_stop"() : () -> ()
    %cst_9 = arith.constant dense<0xFF800000> : vector<1x8xf32>
    %20 = vector.multi_reduction <maximumf>, %19, %cst_9 [2] : vector<1x8x8xf32> to vector<1x8xf32>
    %21 = vector.shape_cast %20 : vector<1x8xf32> to vector<1x8x1xf32>
    %22 = vector.broadcast %21 : vector<1x8x1xf32> to vector<1x8x8xf32>
    %23 = arith.subf %19, %22 : vector<1x8x8xf32>
    %24 = math.exp %23 : vector<1x8x8xf32>
    %cst_10 = arith.constant dense<0.000000e+00> : vector<1x8xf32>
    %25 = vector.multi_reduction <add>, %24, %cst_10 [2] : vector<1x8x8xf32> to vector<1x8xf32>
    %26 = vector.shape_cast %25 : vector<1x8xf32> to vector<1x8x1xf32>
    %27 = tpu.reciprocal %26 {approx = true} : vector<1x8x1xf32> -> vector<1x8x1xf32>
    %28 = vector.broadcast %27 : vector<1x8x1xf32> to vector<1x8x8xf32>
    %29 = arith.mulf %24, %28 : vector<1x8x8xf32>
    %30 = arith.truncf %29 : vector<1x8x8xf32> to vector<1x8x8xbf16>
    "tpu.trace_start"() <{level = 10 : i32, message = "bqk,bkf->bqf"}> : () -> ()
    %cst_11 = arith.constant dense<0.000000e+00> : vector<1x8x8xf32>
    %31 = tpu.matmul %30, %18, %cst_11 {dimension_numbers = #tpu.dot_dimension_numbers<[2], [1], [1], [2], [0, 0, 0, 1, 1, 2], [0], [0]>} : vector<1x8x8xbf16>, vector<1x8x8xbf16>, vector<1x8x8xf32> -> vector<1x8x8xf32>
    "tpu.trace_stop"() : () -> ()
    %32 = vector.shape_cast %31 : vector<1x8x8xf32> to vector<8x8xf32>
    %33 = vector.extract_strided_slice %12 {offsets = [0, 8], sizes = [8, 8], strides = [1, 1]} : vector<8x96xbf16> to vector<8x8xbf16>
    %34 = vector.shape_cast %33 : vector<8x8xbf16> to vector<1x8x8xbf16>
    %35 = vector.extract_strided_slice %12 {offsets = [0, 40], sizes = [8, 8], strides = [1, 1]} : vector<8x96xbf16> to vector<8x8xbf16>
    %36 = vector.shape_cast %35 : vector<8x8xbf16> to vector<1x8x8xbf16>
    %37 = vector.extract_strided_slice %12 {offsets = [0, 72], sizes = [8, 8], strides = [1, 1]} : vector<8x96xbf16> to vector<8x8xbf16>
    %38 = vector.shape_cast %37 : vector<8x8xbf16> to vector<1x8x8xbf16>
    "tpu.trace_start"() <{level = 10 : i32, message = "bqf,bkf->bqk"}> : () -> ()
    %cst_12 = arith.constant dense<0.000000e+00> : vector<1x8x8xf32>
    %39 = tpu.matmul %34, %36, %cst_12 {dimension_numbers = #tpu.dot_dimension_numbers<[2], [2], [1], [1], [0, 0, 0, 1, 1, 1], [0], [0]>} : vector<1x8x8xbf16>, vector<1x8x8xbf16>, vector<1x8x8xf32> -> vector<1x8x8xf32>
    "tpu.trace_stop"() : () -> ()
    %cst_13 = arith.constant dense<0xFF800000> : vector<1x8xf32>
    %40 = vector.multi_reduction <maximumf>, %39, %cst_13 [2] : vector<1x8x8xf32> to vector<1x8xf32>
    %41 = vector.shape_cast %40 : vector<1x8xf32> to vector<1x8x1xf32>
    %42 = vector.broadcast %41 : vector<1x8x1xf32> to vector<1x8x8xf32>
    %43 = arith.subf %39, %42 : vector<1x8x8xf32>
    %44 = math.exp %43 : vector<1x8x8xf32>
    %cst_14 = arith.constant dense<0.000000e+00> : vector<1x8xf32>
    %45 = vector.multi_reduction <add>, %44, %cst_14 [2] : vector<1x8x8xf32> to vector<1x8xf32>
    %46 = vector.shape_cast %45 : vector<1x8xf32> to vector<1x8x1xf32>
    %47 = tpu.reciprocal %46 {approx = true} : vector<1x8x1xf32> -> vector<1x8x1xf32>
    %48 = vector.broadcast %47 : vector<1x8x1xf32> to vector<1x8x8xf32>
    %49 = arith.mulf %44, %48 : vector<1x8x8xf32>
    %50 = arith.truncf %49 : vector<1x8x8xf32> to vector<1x8x8xbf16>
    "tpu.trace_start"() <{level = 10 : i32, message = "bqk,bkf->bqf"}> : () -> ()
    %cst_15 = arith.constant dense<0.000000e+00> : vector<1x8x8xf32>
    %51 = tpu.matmul %50, %38, %cst_15 {dimension_numbers = #tpu.dot_dimension_numbers<[2], [1], [1], [2], [0, 0, 0, 1, 1, 2], [0], [0]>} : vector<1x8x8xbf16>, vector<1x8x8xbf16>, vector<1x8x8xf32> -> vector<1x8x8xf32>
    "tpu.trace_stop"() : () -> ()
    %52 = vector.shape_cast %51 : vector<1x8x8xf32> to vector<8x8xf32>
    %53 = vector.extract_strided_slice %12 {offsets = [0, 16], sizes = [8, 8], strides = [1, 1]} : vector<8x96xbf16> to vector<8x8xbf16>
    %54 = vector.shape_cast %53 : vector<8x8xbf16> to vector<1x8x8xbf16>
    %55 = vector.extract_strided_slice %12 {offsets = [0, 48], sizes = [8, 8], strides = [1, 1]} : vector<8x96xbf16> to vector<8x8xbf16>
    %56 = vector.shape_cast %55 : vector<8x8xbf16> to vector<1x8x8xbf16>
    %57 = vector.extract_strided_slice %12 {offsets = [0, 80], sizes = [8, 8], strides = [1, 1]} : vector<8x96xbf16> to vector<8x8xbf16>
    %58 = vector.shape_cast %57 : vector<8x8xbf16> to vector<1x8x8xbf16>
    "tpu.trace_start"() <{level = 10 : i32, message = "bqf,bkf->bqk"}> : () -> ()
    %cst_16 = arith.constant dense<0.000000e+00> : vector<1x8x8xf32>
    %59 = tpu.matmul %54, %56, %cst_16 {dimension_numbers = #tpu.dot_dimension_numbers<[2], [2], [1], [1], [0, 0, 0, 1, 1, 1], [0], [0]>} : vector<1x8x8xbf16>, vector<1x8x8xbf16>, vector<1x8x8xf32> -> vector<1x8x8xf32>
    "tpu.trace_stop"() : () -> ()
    %cst_17 = arith.constant dense<0xFF800000> : vector<1x8xf32>
    %60 = vector.multi_reduction <maximumf>, %59, %cst_17 [2] : vector<1x8x8xf32> to vector<1x8xf32>
    %61 = vector.shape_cast %60 : vector<1x8xf32> to vector<1x8x1xf32>
    %62 = vector.broadcast %61 : vector<1x8x1xf32> to vector<1x8x8xf32>
    %63 = arith.subf %59, %62 : vector<1x8x8xf32>
    %64 = math.exp %63 : vector<1x8x8xf32>
    %cst_18 = arith.constant dense<0.000000e+00> : vector<1x8xf32>
    %65 = vector.multi_reduction <add>, %64, %cst_18 [2] : vector<1x8x8xf32> to vector<1x8xf32>
    %66 = vector.shape_cast %65 : vector<1x8xf32> to vector<1x8x1xf32>
    %67 = tpu.reciprocal %66 {approx = true} : vector<1x8x1xf32> -> vector<1x8x1xf32>
    %68 = vector.broadcast %67 : vector<1x8x1xf32> to vector<1x8x8xf32>
    %69 = arith.mulf %64, %68 : vector<1x8x8xf32>
    %70 = arith.truncf %69 : vector<1x8x8xf32> to vector<1x8x8xbf16>
    "tpu.trace_start"() <{level = 10 : i32, message = "bqk,bkf->bqf"}> : () -> ()
    %cst_19 = arith.constant dense<0.000000e+00> : vector<1x8x8xf32>
    %71 = tpu.matmul %70, %58, %cst_19 {dimension_numbers = #tpu.dot_dimension_numbers<[2], [1], [1], [2], [0, 0, 0, 1, 1, 2], [0], [0]>} : vector<1x8x8xbf16>, vector<1x8x8xbf16>, vector<1x8x8xf32> -> vector<1x8x8xf32>
    "tpu.trace_stop"() : () -> ()
    %72 = vector.shape_cast %71 : vector<1x8x8xf32> to vector<8x8xf32>
    %73 = vector.extract_strided_slice %12 {offsets = [0, 24], sizes = [8, 8], strides = [1, 1]} : vector<8x96xbf16> to vector<8x8xbf16>
    %74 = vector.shape_cast %73 : vector<8x8xbf16> to vector<1x8x8xbf16>
    %75 = vector.extract_strided_slice %12 {offsets = [0, 56], sizes = [8, 8], strides = [1, 1]} : vector<8x96xbf16> to vector<8x8xbf16>
    %76 = vector.shape_cast %75 : vector<8x8xbf16> to vector<1x8x8xbf16>
    %77 = vector.extract_strided_slice %12 {offsets = [0, 88], sizes = [8, 8], strides = [1, 1]} : vector<8x96xbf16> to vector<8x8xbf16>
    %78 = vector.shape_cast %77 : vector<8x8xbf16> to vector<1x8x8xbf16>
    "tpu.trace_start"() <{level = 10 : i32, message = "bqf,bkf->bqk"}> : () -> ()
    %cst_20 = arith.constant dense<0.000000e+00> : vector<1x8x8xf32>
    %79 = tpu.matmul %74, %76, %cst_20 {dimension_numbers = #tpu.dot_dimension_numbers<[2], [2], [1], [1], [0, 0, 0, 1, 1, 1], [0], [0]>} : vector<1x8x8xbf16>, vector<1x8x8xbf16>, vector<1x8x8xf32> -> vector<1x8x8xf32>
    "tpu.trace_stop"() : () -> ()
    %cst_21 = arith.constant dense<0xFF800000> : vector<1x8xf32>
    %80 = vector.multi_reduction <maximumf>, %79, %cst_21 [2] : vector<1x8x8xf32> to vector<1x8xf32>
    %81 = vector.shape_cast %80 : vector<1x8xf32> to vector<1x8x1xf32>
    %82 = vector.broadcast %81 : vector<1x8x1xf32> to vector<1x8x8xf32>
    %83 = arith.subf %79, %82 : vector<1x8x8xf32>
    %84 = math.exp %83 : vector<1x8x8xf32>
    %cst_22 = arith.constant dense<0.000000e+00> : vector<1x8xf32>
    %85 = vector.multi_reduction <add>, %84, %cst_22 [2] : vector<1x8x8xf32> to vector<1x8xf32>
    %86 = vector.shape_cast %85 : vector<1x8xf32> to vector<1x8x1xf32>
    %87 = tpu.reciprocal %86 {approx = true} : vector<1x8x1xf32> -> vector<1x8x1xf32>
    %88 = vector.broadcast %87 : vector<1x8x1xf32> to vector<1x8x8xf32>
    %89 = arith.mulf %84, %88 : vector<1x8x8xf32>
    %90 = arith.truncf %89 : vector<1x8x8xf32> to vector<1x8x8xbf16>
    "tpu.trace_start"() <{level = 10 : i32, message = "bqk,bkf->bqf"}> : () -> ()
    %cst_23 = arith.constant dense<0.000000e+00> : vector<1x8x8xf32>
    %91 = tpu.matmul %90, %78, %cst_23 {dimension_numbers = #tpu.dot_dimension_numbers<[2], [1], [1], [2], [0, 0, 0, 1, 1, 2], [0], [0]>} : vector<1x8x8xbf16>, vector<1x8x8xbf16>, vector<1x8x8xf32> -> vector<1x8x8xf32>
    "tpu.trace_stop"() : () -> ()
    %92 = vector.shape_cast %91 : vector<1x8x8xf32> to vector<8x8xf32>
    %93 = tpu.concatenate %32, %52, %72, %92 in 1 : vector<8x8xf32>, vector<8x8xf32>, vector<8x8xf32>, vector<8x8xf32> -> vector<8x32xf32>
    %94 = arith.truncf %93 : vector<8x32xf32> to vector<8x32xbf16>
    %c0_24 = arith.constant 0 : index
    %c0_25 = arith.constant 0 : index
    %c0_26 = arith.constant 0 : index
    %95 = vector.load %arg5[%c0_24, %c0_25, %c0_26] : memref<1x32x32xbf16, #tpu.memory_space<vmem>>, vector<1x32x32xbf16>
    %96 = vector.shape_cast %95 : vector<1x32x32xbf16> to vector<32x32xbf16>
    %cst_27 = arith.constant dense<0.000000e+00> : vector<8x32xf32>
    %97 = tpu.matmul %94, %96, %cst_27 {dimension_numbers = #tpu.dot_dimension_numbers<[1], [0], [0], [1], [0, 0, 1, 1], [], []>} : vector<8x32xbf16>, vector<32x32xbf16>, vector<8x32xf32> -> vector<8x32xf32>
    %c0_28 = arith.constant 0 : index
    %c0_29 = arith.constant 0 : index
    %c0_30 = arith.constant 0 : index
    %98 = vector.load %arg6[%c0_28, %c0_29, %c0_30] : memref<1x1x32xf32, #tpu.memory_space<vmem>>, vector<1x1x32xf32>
    %99 = vector.shape_cast %98 : vector<1x1x32xf32> to vector<1x32xf32>
    %100 = vector.broadcast %99 : vector<1x32xf32> to vector<8x32xf32>
    %101 = arith.addf %97, %100 : vector<8x32xf32>
    %102 = arith.addf %3, %101 : vector<8x32xf32>
    %c0_31 = arith.constant 0 : index
    %c0_32 = arith.constant 0 : index
    %c0_33 = arith.constant 0 : index
    %103 = vector.load %arg7[%c0_31, %c0_32, %c0_33] : memref<1x1x32xf32, #tpu.memory_space<vmem>>, vector<1x1x32xf32>
    %104 = vector.shape_cast %103 : vector<1x1x32xf32> to vector<1x32xf32>
    %c0_34 = arith.constant 0 : index
    %c0_35 = arith.constant 0 : index
    %c0_36 = arith.constant 0 : index
    %105 = vector.load %arg8[%c0_34, %c0_35, %c0_36] : memref<1x1x32xf32, #tpu.memory_space<vmem>>, vector<1x1x32xf32>
    %106 = vector.shape_cast %105 : vector<1x1x32xf32> to vector<1x32xf32>
    %cst_37 = arith.constant dense<0.000000e+00> : vector<8xf32>
    %107 = vector.multi_reduction <add>, %102, %cst_37 [1] : vector<8x32xf32> to vector<8xf32>
    %108 = vector.shape_cast %107 : vector<8xf32> to vector<8x1xf32>
    %cst_38 = arith.constant 3.200000e+01 : f32
    %109 = vector.broadcast %cst_38 : f32 to vector<8x1xf32>
    %110 = arith.divf %108, %109 : vector<8x1xf32>
    %111 = vector.broadcast %110 : vector<8x1xf32> to vector<8x32xf32>
    %112 = arith.subf %102, %111 : vector<8x32xf32>
    %113 = arith.mulf %112, %112 : vector<8x32xf32>
    %cst_39 = arith.constant dense<0.000000e+00> : vector<8xf32>
    %114 = vector.multi_reduction <add>, %113, %cst_39 [1] : vector<8x32xf32> to vector<8xf32>
    %115 = vector.shape_cast %114 : vector<8xf32> to vector<8x1xf32>
    %cst_40 = arith.constant 3.200000e+01 : f32
    %116 = vector.broadcast %cst_40 : f32 to vector<8x1xf32>
    %117 = arith.divf %115, %116 : vector<8x1xf32>
    %118 = vector.broadcast %110 : vector<8x1xf32> to vector<8x32xf32>
    %119 = arith.subf %102, %118 : vector<8x32xf32>
    %cst_41 = arith.constant 9.99999974E-6 : f32
    %120 = vector.broadcast %cst_41 : f32 to vector<8x1xf32>
    %121 = arith.addf %117, %120 : vector<8x1xf32>
    %122 = math.rsqrt %121 : vector<8x1xf32>
    %123 = vector.broadcast %122 : vector<8x1xf32> to vector<8x32xf32>
    %124 = arith.mulf %119, %123 : vector<8x32xf32>
    %125 = vector.broadcast %104 : vector<1x32xf32> to vector<8x32xf32>
    %126 = arith.mulf %124, %125 : vector<8x32xf32>
    %127 = vector.broadcast %106 : vector<1x32xf32> to vector<8x32xf32>
    %128 = arith.addf %126, %127 : vector<8x32xf32>
    %129 = arith.truncf %128 : vector<8x32xf32> to vector<8x32xbf16>
    %c0_42 = arith.constant 0 : index
    %c0_43 = arith.constant 0 : index
    %c0_44 = arith.constant 0 : index
    %130 = vector.load %arg9[%c0_42, %c0_43, %c0_44] : memref<1x32x2048xbf16, #tpu.memory_space<vmem>>, vector<1x32x2048xbf16>
    %131 = vector.shape_cast %130 : vector<1x32x2048xbf16> to vector<32x2048xbf16>
    %cst_45 = arith.constant dense<0.000000e+00> : vector<8x2048xf32>
    %132 = tpu.matmul %129, %131, %cst_45 {dimension_numbers = #tpu.dot_dimension_numbers<[1], [0], [0], [1], [0, 0, 1, 1], [], []>} : vector<8x32xbf16>, vector<32x2048xbf16>, vector<8x2048xf32> -> vector<8x2048xf32>
    %c0_46 = arith.constant 0 : index
    %c0_47 = arith.constant 0 : index
    %c0_48 = arith.constant 0 : index
    %133 = vector.load %arg10[%c0_46, %c0_47, %c0_48] : memref<1x1x2048xf32, #tpu.memory_space<vmem>>, vector<1x1x2048xf32>
    %134 = vector.shape_cast %133 : vector<1x1x2048xf32> to vector<1x2048xf32>
    %135 = vector.broadcast %134 : vector<1x2048xf32> to vector<8x2048xf32>
    %136 = arith.addf %132, %135 : vector<8x2048xf32>
    %cst_49 = arith.constant 0.000000e+00 : f32
    %137 = vector.broadcast %cst_49 : f32 to vector<8x2048xf32>
    %138 = arith.maximumf %136, %137 : vector<8x2048xf32>
    %139 = arith.truncf %138 : vector<8x2048xf32> to vector<8x2048xbf16>
    %c0_50 = arith.constant 0 : index
    %c0_51 = arith.constant 0 : index
    %c0_52 = arith.constant 0 : index
    %140 = vector.load %arg11[%c0_50, %c0_51, %c0_52] : memref<1x2048x32xbf16, #tpu.memory_space<vmem>>, vector<1x2048x32xbf16>
    %141 = vector.shape_cast %140 : vector<1x2048x32xbf16> to vector<2048x32xbf16>
    %cst_53 = arith.constant dense<0.000000e+00> : vector<8x32xf32>
    %142 = tpu.matmul %139, %141, %cst_53 {dimension_numbers = #tpu.dot_dimension_numbers<[1], [0], [0], [1], [0, 0, 1, 1], [], []>} : vector<8x2048xbf16>, vector<2048x32xbf16>, vector<8x32xf32> -> vector<8x32xf32>
    %c0_54 = arith.constant 0 : index
    %c0_55 = arith.constant 0 : index
    %c0_56 = arith.constant 0 : index
    %143 = vector.load %arg12[%c0_54, %c0_55, %c0_56] : memref<1x1x32xf32, #tpu.memory_space<vmem>>, vector<1x1x32xf32>
    %144 = vector.shape_cast %143 : vector<1x1x32xf32> to vector<1x32xf32>
    %145 = vector.broadcast %144 : vector<1x32xf32> to vector<8x32xf32>
    %146 = arith.addf %142, %145 : vector<8x32xf32>
    %147 = arith.addf %128, %146 : vector<8x32xf32>
    %c0_57 = arith.constant 0 : index
    %c0_58 = arith.constant 0 : index
    %c0_59 = arith.constant 0 : index
    %148 = vector.load %arg13[%c0_57, %c0_58, %c0_59] : memref<1x1x32xf32, #tpu.memory_space<vmem>>, vector<1x1x32xf32>
    %149 = vector.shape_cast %148 : vector<1x1x32xf32> to vector<1x32xf32>
    %c0_60 = arith.constant 0 : index
    %c0_61 = arith.constant 0 : index
    %c0_62 = arith.constant 0 : index
    %150 = vector.load %arg14[%c0_60, %c0_61, %c0_62] : memref<1x1x32xf32, #tpu.memory_space<vmem>>, vector<1x1x32xf32>
    %151 = vector.shape_cast %150 : vector<1x1x32xf32> to vector<1x32xf32>
    %cst_63 = arith.constant dense<0.000000e+00> : vector<8xf32>
    %152 = vector.multi_reduction <add>, %147, %cst_63 [1] : vector<8x32xf32> to vector<8xf32>
    %153 = vector.shape_cast %152 : vector<8xf32> to vector<8x1xf32>
    %cst_64 = arith.constant 3.200000e+01 : f32
    %154 = vector.broadcast %cst_64 : f32 to vector<8x1xf32>
    %155 = arith.divf %153, %154 : vector<8x1xf32>
    %156 = vector.broadcast %155 : vector<8x1xf32> to vector<8x32xf32>
    %157 = arith.subf %147, %156 : vector<8x32xf32>
    %158 = arith.mulf %157, %157 : vector<8x32xf32>
    %cst_65 = arith.constant dense<0.000000e+00> : vector<8xf32>
    %159 = vector.multi_reduction <add>, %158, %cst_65 [1] : vector<8x32xf32> to vector<8xf32>
    %160 = vector.shape_cast %159 : vector<8xf32> to vector<8x1xf32>
    %cst_66 = arith.constant 3.200000e+01 : f32
    %161 = vector.broadcast %cst_66 : f32 to vector<8x1xf32>
    %162 = arith.divf %160, %161 : vector<8x1xf32>
    %163 = vector.broadcast %155 : vector<8x1xf32> to vector<8x32xf32>
    %164 = arith.subf %147, %163 : vector<8x32xf32>
    %cst_67 = arith.constant 9.99999974E-6 : f32
    %165 = vector.broadcast %cst_67 : f32 to vector<8x1xf32>
    %166 = arith.addf %162, %165 : vector<8x1xf32>
    %167 = math.rsqrt %166 : vector<8x1xf32>
    %168 = vector.broadcast %167 : vector<8x1xf32> to vector<8x32xf32>
    %169 = arith.mulf %164, %168 : vector<8x32xf32>
    %170 = vector.broadcast %149 : vector<1x32xf32> to vector<8x32xf32>
    %171 = arith.mulf %169, %170 : vector<8x32xf32>
    %172 = vector.broadcast %151 : vector<1x32xf32> to vector<8x32xf32>
    %173 = arith.addf %171, %172 : vector<8x32xf32>
    %c0_68 = arith.constant 0 : index
    %c0_69 = arith.constant 0 : index
    %174 = vector.load %arg15[%c0_68, %c0_69] : memref<8x32xf32, #tpu.memory_space<vmem>>, vector<8x32xf32>
    tpu.vector_store %arg15[%c0_68, %c0_69], %173 {strides = array<i32>} : memref<8x32xf32, #tpu.memory_space<vmem>>, vector<8x32xf32>,
    return
  }
  func.func @transform_0(%arg0: i32, %arg1: i32) -> (i32, i32) {
    %c0_i32 = arith.constant 0 : i32
    %c0_i32_0 = arith.constant 0 : i32
    return %arg0, %c0_i32 : i32, i32
  }
  func.func @transform_1(%arg0: i32, %arg1: i32) -> (i32, i32, i32) {
    %c0_i32 = arith.constant 0 : i32
    %c0_i32_0 = arith.constant 0 : i32
    %c0_i32_1 = arith.constant 0 : i32
    return %arg1, %c0_i32, %c0_i32_0 : i32, i32, i32
  }
  func.func @transform_2(%arg0: i32, %arg1: i32) -> (i32, i32, i32) {
    %c0_i32 = arith.constant 0 : i32
    %c0_i32_0 = arith.constant 0 : i32
    %c0_i32_1 = arith.constant 0 : i32
    return %arg1, %c0_i32, %c0_i32_0 : i32, i32, i32
  }
  func.func @transform_3(%arg0: i32, %arg1: i32) -> (i32, i32, i32) {
    %c0_i32 = arith.constant 0 : i32
    %c0_i32_0 = arith.constant 0 : i32
    %c0_i32_1 = arith.constant 0 : i32
    return %arg1, %c0_i32, %c0_i32_0 : i32, i32, i32
  }
  func.func @transform_4(%arg0: i32, %arg1: i32) -> (i32, i32, i32) {
    %c0_i32 = arith.constant 0 : i32
    %c0_i32_0 = arith.constant 0 : i32
    %c0_i32_1 = arith.constant 0 : i32
    return %arg1, %c0_i32, %c0_i32_0 : i32, i32, i32
  }
  func.func @transform_5(%arg0: i32, %arg1: i32) -> (i32, i32, i32) {
    %c0_i32 = arith.constant 0 : i32
    %c0_i32_0 = arith.constant 0 : i32
    %c0_i32_1 = arith.constant 0 : i32
    return %arg1, %c0_i32, %c0_i32_0 : i32, i32, i32
  }
  func.func @transform_6(%arg0: i32, %arg1: i32) -> (i32, i32, i32) {
    %c0_i32 = arith.constant 0 : i32
    %c0_i32_0 = arith.constant 0 : i32
    %c0_i32_1 = arith.constant 0 : i32
    return %arg1, %c0_i32, %c0_i32_0 : i32, i32, i32
  }
  func.func @transform_7(%arg0: i32, %arg1: i32) -> (i32, i32, i32) {
    %c0_i32 = arith.constant 0 : i32
    %c0_i32_0 = arith.constant 0 : i32
    %c0_i32_1 = arith.constant 0 : i32
    return %arg1, %c0_i32, %c0_i32_0 : i32, i32, i32
  }
  func.func @transform_8(%arg0: i32, %arg1: i32) -> (i32, i32, i32) {
    %c0_i32 = arith.constant 0 : i32
    %c0_i32_0 = arith.constant 0 : i32
    %c0_i32_1 = arith.constant 0 : i32
    return %arg1, %c0_i32, %c0_i32_0 : i32, i32, i32
  }
  func.func @transform_9(%arg0: i32, %arg1: i32) -> (i32, i32, i32) {
    %c0_i32 = arith.constant 0 : i32
    %c0_i32_0 = arith.constant 0 : i32
    %c0_i32_1 = arith.constant 0 : i32
    return %arg1, %c0_i32, %c0_i32_0 : i32, i32, i32
  }
  func.func @transform_10(%arg0: i32, %arg1: i32) -> (i32, i32, i32) {
    %c0_i32 = arith.constant 0 : i32
    %c0_i32_0 = arith.constant 0 : i32
    %c0_i32_1 = arith.constant 0 : i32
    return %arg1, %c0_i32, %c0_i32_0 : i32, i32, i32
  }
  func.func @transform_11(%arg0: i32, %arg1: i32) -> (i32, i32, i32) {
    %c0_i32 = arith.constant 0 : i32
    %c0_i32_0 = arith.constant 0 : i32
    %c0_i32_1 = arith.constant 0 : i32
    return %arg1, %c0_i32, %c0_i32_0 : i32, i32, i32
  }
  func.func @transform_12(%arg0: i32, %arg1: i32) -> (i32, i32, i32) {
    %c0_i32 = arith.constant 0 : i32
    %c0_i32_0 = arith.constant 0 : i32
    %c0_i32_1 = arith.constant 0 : i32
    return %arg1, %c0_i32, %c0_i32_0 : i32, i32, i32
  }
  func.func @transform_13(%arg0: i32, %arg1: i32) -> (i32, i32) {
    %c0_i32 = arith.constant 0 : i32
    %c0_i32_0 = arith.constant 0 : i32
    return %arg0, %c0_i32 : i32, i32
  }
}

</mosaic_0001>

<bundles_post_ra>
// kernel: tpu_custom_call.1
= control target key start
LH: loop header
LB: loop body
LE: loop exit
PB: predicated region body
PF: predicated region fallthrough
CT: control target
= control target key end

     0   :  { %s4990_s0 = inlined_call_operand.vmem [shape: f32[16,32], index: 0, kind: input, shape index: {}]   ;;  %s4991_s1 = inlined_call_operand.vmem [shape: bf16[2,32,96], index: 1, kind: input, shape index: {}]   ;;  %s4992_s2 = inlined_call_operand.vmem [shape: f32[2,1,96], index: 2, kind: input, shape index: {}]   ;;  %s4993_s3 = inlined_call_operand.vmem [shape: bf16[2,32,32], index: 3, kind: input, shape index: {}]   ;;  %s4994_s4 = inlined_call_operand.vmem [shape: f32[2,1,32], index: 4, kind: input, shape index: {}]   ;;  %s4995_s5 = inlined_call_operand.vmem [shape: f32[2,1,32], index: 5, kind: input, shape index: {}]   ;;  %s4996_s6 = inlined_call_operand.vmem [shape: f32[2,1,32], index: 6, kind: input, shape index: {}]   ;;  %s4997_s7 = inlined_call_operand.vmem [shape: bf16[2,32,2048], index: 7, kind: input, shape index: {}]   ;;  %s4998_s8 = inlined_call_operand.vmem [shape: f32[2,1,2048], index: 8, kind: input, shape index: {}]   ;;  %s4999_s9 = inlined_call_operand.vmem [shape: bf16[2,2048,32], index: 9, kind: input, shape index: {}]   ;;  %s5000_s10 = inlined_call_operand.vmem [shape: f32[2,1,32], index: 10, kind: input, shape index: {}]   ;;  %s5001_s11 = inlined_call_operand.vmem [shape: f32[2,1,32], index: 11, kind: input, shape index: {}]   ;;  %s5002_s12 = inlined_call_operand.vmem [shape: f32[2,1,32], index: 12, kind: input, shape index: {}]   ;;  %s5003_s13 = inlined_call_operand.hbm [shape: f32[16,32], index: 13, kind: output, shape index: {}]  }
   0x1   :  { %5019 = sst [smem:[#allocation18_spill]] %s4990_s0 }
   0x2   :  { %5020 = sst [smem:[#allocation19_spill]] %s4991_s1 }
   0x3   :  { %5021 = sst [smem:[#allocation20_spill]] %s4993_s3 }
   0x4   :  { %5022 = sst [smem:[#allocation21_spill]] %s4998_s8 }
   0x5   :  { %5023 = sst [smem:[#allocation22_spill]] %s5002_s12 }
   0x6   :  { %5024 = sst [smem:[#allocation23_spill]] %s5003_s13 }
   0x7   :  { %18 = vsyncpa [#allocation3], 0 }
   0x8   :  { %20 = vsyncpa [#allocation3 + $0x1], 0  ;;  %s4404_s25 = smov 0   ;;  %s4406_s26 = smov 0  }
   0x9   :  { %s4408_s27 = smov 0   ;;  %s4410_s28 = smov 0  }
   0xa   :  { %s4412_s29 = smov 0   ;;  %s4414_s30 = smov 0  }
   0xb   :  { %s4416_s14 = smov 0   ;;  %s4418_s15 = smov 0  }
   0xc LB: > { %5025 = sst [smem:[#allocation5_spill]] %s4286_s25  ;;  %s3506_s16 = sadd.s32 4294967295, %s4314_s15   ;;  %s4314_s15 = sphi %s4418_s15, %s26_s15   ;;  %s4310_s14 = sphi %s4416_s14, %s5065_s14   ;;  %s4306_s30 = sphi %s4414_s30, %s5064_s30   ;;  %s4302_s29 = sphi %s4412_s29, %s5063_s29   ;;  %s4298_s28 = sphi %s4410_s28, %s5062_s28   ;;  %s4294_s27 = sphi %s4408_s27, %s5061_s27   ;;  %s4290_s26 = sphi %s4406_s26, %s5060_s26   ;;  %s4286_s25 = sphi %s4404_s25, %s5059_s25  }
   0xd   : > { %5026 = sst [smem:[#allocation6_spill]] %s4290_s26  ;;  %s3507_s17 = sadd.s32 4294967294, %s4314_s15  }
   0xe   : > { %5027 = sst [smem:[#allocation7_spill]] %s4294_s27  ;;  %s35_s18 = sadd.s32 1, %s4306_s30 }
   0xf   : > { %5028 = sst [smem:[#allocation8_spill]] %s4298_s28  ;;  %p36_p0 = scmp.ge.s32.totalorder %s35_s18, 2 }
  0x10   : > { %5029 = sst [smem:[#allocation9_spill]] %s4302_s29  ;;  %s38_s19 = sadd.s32 1, %s4310_s14 }
  0x11   : > { %5030 = sst [smem:[#allocation10_spill]] %s4306_s30  ;;  %p393_p1 = scmp.ne.s32.totalorder %s4294_s27, %s4290_s26 }
  0x12   : > { %5031 = sst [smem:[#allocation11_spill]] %s4310_s14  ;;  %p394_p2 = scmp.eq.s32.totalorder %s3506_s16, 3 }
  0x13   : > { %5032 = sst [smem:[#allocation12_spill]] %s4314_s15  ;;  %s5067_s18 = smov (%p36_p0, %s35_s18), 0 }
  0x14   : > { %5033 = sst [smem:[#allocation13_spill]] %s5067_s18  ;;  %s5069_s19 = smov (!%p36_p0, %s38_s19), %s4310_s14 }
  0x15   : > { %p4453_p3 = por %p394_p2, %p393_p1  ;;  %p399_p4 = scmp.ne.s32.totalorder %s4290_s26, %s4286_s25 }
  0x16   : > { %p40_p5 = scmp.ge.s32.totalorder %s5069_s19, 2  ;;  %p400_p6 = scmp.eq.s32.totalorder %s3507_s17, 3 }
  0x17   : > { %s5034_s20 = scalar_select %p4453_p3, 1, 0 }
  0x18   : > { %p3510_p7 = scmp.ge.s32.totalorder %s4314_s15, 1  ;;  %p506_p8 = scmp.lt.s32.totalorder %s4314_s15, 5 }
  0x19   : > { %5035 = sst [smem:[#allocation14_spill]] %s5034_s20  ;;  %s5071_s19 = smov (%p40_p5, %s5069_s19), 0 }
  0x1a   : > { %5036 = sst [smem:[#allocation15_spill]] %s5071_s19  ;;  %p4463_p9 = por %p400_p6, %p399_p4 }
  0x1b   : > { %p507_p10 = pnand %p3510_p7, %p506_p8  ;;  %s380_s22 = ssub.s32 %s4310_s14, %s5071_s19 }
  0x1c   : > { %s5037_s21 = scalar_select %p4463_p9, 1, 0 }
  0x1d   : > { %s383_s23 = sadd.s32 1, %s4294_s27  ;;  %p381_p11 = scmp.eq.s32.totalorder %s380_s22, 0 }
  0x1e   : > { %5038 = sst [smem:[#allocation16_spill]] %s5037_s21  ;;  %510 = sbr.rel (%p507_p10) target bundleno = 2593 (0xa21), region = 72 }
  0x1f   : > { %s4471_s24 = scalar_select %p381_p11, %s4294_s27, %s383_s23  }
  0x20   : > { %s5007_s16 = sand.u32 (!%p507_p10), 1, %s4290_s26   ;;  %p594_p12 = scmp.lt.s32.totalorder (!%p507_p10), %s4302_s29, 1 }
  0x21   : > { %5039 = sst [smem:[#allocation17_spill]] %s4471_s24  ;;  %s3511_s17 = sshll.u32 (!%p507_p10), %s5007_s16, 3 }
  0x22   : > { %p598_p13 = scmp.lt.s32.totalorder (!%p507_p10), %s4298_s28, 1  ;;  %s5040_s0 = sld [smem:[#allocation18_spill]] (!%p507_p10) }
  0x23   : > { %s595_s18 = scalar_select %p594_p12, %s4302_s29, 1 }
  0x24   : > { %s4480_s30 = scalar_select %p598_p13, %s4298_s28, 1 }
  0x25   : > { %s3512_s22 = sshll.u32 %s595_s18, 3  ;;  %s5041_s1 = sld [smem:[#allocation19_spill]] }
  0x26   : > { %s3716_s16 = sshll.u32 %s4480_s30, 4  ;;  %s5042_s3 = sld [smem:[#allocation20_spill]] }
  0x27   : > { %s5043_s8 = sld [smem:[#allocation21_spill]]  ;;  %s3719_s28 = sshll.u32 %s4480_s30, 10 }
  0x28   : > { %s597_s14 = scalar_lea.vmem %s5040_s0, %s3512_s22  ;;  %s4525_s23 = scalar_lea.vmem %s4999_s9, %s3719_s28 }
  0x29   : > { %s636_s27 = scalar_lea.vmem %s5000_s10, %s4480_s30  ;;  %s5045_s20 = sld [smem:[#allocation8_spill]] }
  0x2b   : > { %s602_s21 = scalar_lea.vmem %s5041_s1, %s3716_s16  ;;  %s3718_s1 = sshll.u32 %s4480_s30, 8 }
  0x2c   : > { %s4496_s29 = scalar_lea.vmem %s5042_s3, %s3716_s16  ;;  %s4519_s3 = scalar_lea.vmem %s4997_s7, %s3718_s1 }
  0x2d   : > { %s4514_s13 = scalar_lea.vmem %s5043_s8, %s3716_s16  ;;  %s639_s16 = scalar_lea.vmem %s5001_s11, %s4480_s30 }
  0x2e   : > { %s5044_s8 = sld [smem:[#allocation22_spill]]  ;;  %s4539_s1 = scalar_lea.vmem [#allocation2], %s3511_s17 }
  0x2f   : > { %p3522_p0 = scmp.ne.s32.totalorder %s5045_s20, 0 }
  0x31   : > { %647 = sbr.rel (%p3522_p0) target bundleno = 56 (0x38), region = 76 }
  0x34   : > { %s642_s26 = scalar_lea.vmem %s5044_s8, %s4480_s30 }
  0x36   : > { %v648_v0 = vld [vmem:[%s597_s14] sm:$0xff]  ;;  %vm649_vm0 = vcmask 261120  }
  0x37   : > { %650 = vst.msk [vmem:[%s4539_s1] sm:$0xff] %vm649_vm0, %v648_v0 }
  0x38 PF: > { %v4070_v1 = vld [vmem:[%s602_s21 + $0x8] sm:$0xff]   ;;  %v4316_v2 = vmov 0.0   ;;  %v4071_v3 = vld [vmem:[%s602_s21] sm:$0xff]   ;;  %vm4317_vm1 = vmmov 0   ;;  %vm676_vm2 = vcmask 261120   ;;  %s5046_s14 = scalar_lea.vmem %s4992_s2, %s4480_s30  ;;  %s4318_s21 = smov 120  }
  0x39   : > { %3918 = vmatprep.subr.bf16.mxu0 %v4316_v2  ;;  %3926 = vmatprep.subr.bf16.mxu1 %v4316_v2  ;;  %v3523_v6 = vld [vmem:[%s5046_s14] ss:$0 sm:$0xff]  ;;  %s4319_s17 = smov 96   ;;  %s4320_s19 = smov 80   ;;  %vm724_vm3 = vcmask 64512   ;;  %vm788_vm4 = vcmask 1043456  }
  0x3a   : > { %3919 = vmatpush3.bf16.msra.mxu0 %v4070_v1  ;;  %3922 = vmatprep.mubr.msk.bf16.mxu0 %vm4317_vm1, %v4316_v2  ;;  %s4321_s24 = smov 88   ;;  %s4322_s28 = smov 72   ;;  %vm1175_vm5 = vcmask 130048   ;;  %vm1177_vm6 = vcmask 195584  }
  0x3b   : > { %3920 = vmatprep.subr.bf16.mxu0 %v4316_v2  ;;  %3928 = vmatprep.mubr.msk.bf16.mxu1 %vm4317_vm1, %v4316_v2  ;;  %s4323_s18 = smov 112   ;;  %s4324_s22 = smov 104  }
  0x3c   : > { %s4325_s12 = smov 56   ;;  %s4326_s25 = smov 64  }
  0x3d   : > { %s4327_s15 = smov 40   ;;  %s4328_s20 = smov 48  }
  0x3e   : > { %v4548_v4 = vld [vmem:[%s4539_s1] sm:$0xff]  ;;  %3921 = vmatpush3.bf16.msra.mxu0 %v4071_v3  ;;  %s4329_s0 = smov 8   ;;  %s4330_s8 = smov 16  }
  0x3f   : > { %v652_v5 = vpack.c.bf16 %v4548_v4, %v4548_v4  ;;  %3932 = vmatprep.subr.bf16.mxu0 %v4316_v2  ;;  %s4331_s14 = smov 24  }
  0x41   : > { %3923 = vmatmul.mubr.msk.bf16.vlgmr.msra.gmra.mxu0 %vm676_vm2, %v652_v5 }
  0x42   : > { %3934 = vmatprep.mubr.msk.bf16.mxu0 %vm4317_vm1, %v4316_v2 }
 0x101   : > { %v714_v7 = vpop.f32.mrf.mxu0 }
 0x102   : > { %v715_v8 = vadd.f32 %v3523_v6, %v714_v7 }
 0x103   : > { %v3924_v9 = vpop.f32.mrf.mxu0 }
 0x104   : > { %v4564_v10 = vpack.c.bf16 %v715_v8, %v715_v8 }
 0x105   : > { %v717_v11 = vpop.f32.mrf.mxu0 }
 0x106   : > { %832 = vrot.lane.b32.xlu1 %v4564_v10, %s4318_s21  ;;  %722 = vrot.lane.b32.xlu0 %v4564_v10, %s4319_s17  ;;  %s5047_s17 = scalar_lea.vmem %s4994_s4, %s4480_s30  ;;  %s3313_s21 = sshll.u32 %s4539_s1, 4  ;;  %s3314_s21 = int_to_ptr.vmem [resolvable:$true] %s3313_s21 }
 0x107   : > { %v3925_v12 = vpop.f32.mrf.mxu0 }
 0x10a   : > { %944 = vrot.lane.b32.xlu1 %v4564_v10, %s4320_s19  ;;  %834 = vrot.lane.b32.xlu0 %v4564_v10, %s4321_s24  ;;  %s5054_s24 = sld [smem:[#allocation23_spill]] }
 0x10e   : > { %1054 = vrot.lane.b32.xlu1 %v4564_v10, %s4322_s28  ;;  %942 = vrot.lane.b32.xlu0 %v4564_v10, %s4323_s18  ;;  %s5048_s28 = scalar_lea.vmem %s4995_s5, %s4480_s30 }
 0x112   : > { %1052 = vrot.lane.b32.xlu0 %v4564_v10, %s4324_s22 }
 0x178   : > { %v723_v13 = vpop.permute.xlu0 %722  ;;  %v833_v16 = vpop.permute.xlu1 %832 }
 0x179   : > { %v729_v14 = vsel %vm724_vm3, %v723_v13, 0 }
 0x17a   : > { %3927 = vmatpush3.bf16.xpose.msra.mxu1 %v729_v14 }
 0x17b   : > { %3938 = vmatprep.subr.bf16.mxu1 %v4316_v2 }
 0x17c   : > { %v835_v15 = vpop.permute.xlu0 %834  ;;  %v945_v18 = vpop.permute.xlu1 %944 }
 0x17d   : > { %v840_v17 = vsel %vm724_vm3, %v835_v15, 0  ;;  %v950_v19 = vsel %vm724_vm3, %v945_v18, 0 }
 0x180   : > { %v1055_v20 = vpop.permute.xlu1 %1054  ;;  %v943_v21 = vpop.permute.xlu0 %942 }
 0x181   : > { %3929 = vmatmul.mubr.msk.bf16.vlgmr.msra.gmra.mxu1 %vm724_vm3, %v4564_v10  ;;  %v1060_v22 = vsel %vm724_vm3, %v1055_v20, 0 }
 0x182   : > { %3939 = vmatpush3.bf16.xpose.msra.mxu1 %v840_v17  ;;  %3940 = vmatprep.mubr.msk.bf16.mxu1 %vm4317_vm1, %v4316_v2 }
 0x183   : > { %3950 = vmatprep.subr.bf16.mxu1 %v4316_v2 }
 0x184   : > { %v1053_v23 = vpop.permute.xlu0 %1052 }
 0x189   : > { %3941 = vmatmul.mubr.msk.bf16.vlgmr.msra.gmra.mxu1 %vm724_vm3, %v833_v16 }
 0x18a   : > { %3951 = vmatpush3.bf16.xpose.msra.mxu1 %v950_v19  ;;  %3952 = vmatprep.mubr.msk.bf16.mxu1 %vm4317_vm1, %v4316_v2 }
 0x18b   : > { %3962 = vmatprep.subr.bf16.mxu1 %v4316_v2 }
 0x191   : > { %3953 = vmatmul.mubr.msk.bf16.vlgmr.msra.gmra.mxu1 %vm724_vm3, %v943_v21 }
 0x192   : > { %3963 = vmatpush3.bf16.xpose.msra.mxu1 %v1060_v22  ;;  %3964 = vmatprep.mubr.msk.bf16.mxu1 %vm4317_vm1, %v4316_v2 }
 0x193   : > { %3974 = vmatprep.subr.bf16.mxu1 %v4316_v2 }
 0x199   : > { %3965 = vmatmul.mubr.msk.bf16.vlgmr.msra.gmra.mxu1 %vm724_vm3, %v1053_v23 }
 0x19a   : > { %3978 = vmatprep.mubr.msk.bf16.mxu1 %vm4317_vm1, %v4316_v2 }
 0x241   : > { %v765_v24 = vpop.f32.mrf.mxu1 }
 0x242   : > { %v771_v25 = vsel %vm724_vm3, %v765_v24, -inf }
 0x243   : > { %772 = vmax.xlane.f32.xlu1 %v771_v25  ;;  %v3930_v26 = vpop.f32.mrf.mxu1 }
 0x245   : > { %v768_v27 = vpop.f32.mrf.mxu1 }
 0x247   : > { %v3931_v28 = vpop.f32.mrf.mxu1 }
 0x249   : > { %v876_v29 = vpop.f32.mrf.mxu1 }
 0x24a   : > { %v882_v30 = vsel %vm724_vm3, %v876_v29, -inf }
 0x24b   : > { %883 = vmax.xlane.f32.xlu0 %v882_v30  ;;  %v3942_v31 = vpop.f32.mrf.mxu1 }
 0x24d   : > { %v879_v32 = vpop.f32.mrf.mxu1 }
 0x24f   : > { %v3943_v33 = vpop.f32.mrf.mxu1 }
 0x251   : > { %v986_v34 = vpop.f32.mrf.mxu1 }
 0x252   : > { %v992_v35 = vsel %vm724_vm3, %v986_v34, -inf }
 0x253   : > { %993 = vmax.xlane.f32.xlu0 %v992_v35  ;;  %v3954_v36 = vpop.f32.mrf.mxu1  ;;  %v4073_v35 = vld [vmem:[%s4496_s29] sm:$0xff]  }
 0x255   : > { %v989_v37 = vpop.f32.mrf.mxu1 }
 0x257   : > { %v3955_v38 = vpop.f32.mrf.mxu1 }
 0x259   : > { %v1096_v39 = vpop.f32.mrf.mxu1 }
 0x25a   : > { %v1102_v40 = vsel %vm724_vm3, %v1096_v39, -inf }
 0x25b   : > { %1103 = vmax.xlane.f32.xlu1 %v1102_v40  ;;  %v3966_v41 = vpop.f32.mrf.mxu1 }
 0x25d   : > { %v1099_v42 = vpop.f32.mrf.mxu1 }
 0x25f   : > { %v3967_v43 = vpop.f32.mrf.mxu1 }
 0x2cc   : > { %v773_v44 = vpop.xlane.xlu1 %772 }
 0x2cd   : > { %v774_v45 = vsub.f32 %v765_v24, %v773_v44 }
 0x2cf   : > { %v775_v46 = vmul.f32 1.442695, %v774_v45 }
 0x2d1   : > { %4202 = vpow2.f32 %v775_v46 }
 0x2d4   : > { %v884_v47 = vpop.xlane.xlu0 %883 }
 0x2d5   : > { %v885_v48 = vsub.f32 %v876_v29, %v884_v47 }
 0x2d7   : > { %v886_v49 = vmul.f32 1.442695, %v885_v48 }
 0x2d9   : > { %4204 = vpow2.f32 %v886_v49 }
 0x2dc   : > { %v994_v50 = vpop.xlane.xlu0 %993 }
 0x2dd   : > { %v995_v51 = vsub.f32 %v986_v34, %v994_v50  ;;  %v4072_v34 = vld [vmem:[%s4496_s29 + $0x8] sm:$0xff]   ;;  %v3535_v50 = vld [vmem:[%s5047_s17] ss:$0 sm:$0xff] }
 0x2de   : > { %v4203_v52 = vpop.eup %4202  ;;  %3975 = vmatpush3.bf16.msra.mxu1 %v4072_v34  ;;  %v1288_v34 = vld [vmem:[%s4519_s3 + $0x50] sm:$0xff] }
 0x2df   : > { %v996_v53 = vmul.f32 1.442695, %v995_v51  ;;  %v777_v54 = vsel %vm724_vm3, %v4203_v52, 0.0  ;;  %3976 = vmatprep.subr.bf16.mxu1 %v4316_v2 }
 0x2e0   : > { %778 = vadd.xlane.f32.xlu0 %v777_v54 }
 0x2e1   : > { %4206 = vpow2.f32 %v996_v53 }
 0x2e2   : > { %3977 = vmatpush3.bf16.msra.mxu1 %v4073_v35  ;;  %v1281_v35 = vld [vmem:[%s4519_s3 + $0x18] sm:$0xff] }
 0x2e4   : > { %v1104_v59 = vpop.xlane.xlu1 %1103 }
 0x2e5   : > { %v1105_v60 = vsub.f32 %v1096_v39, %v1104_v59 }
 0x2e6   : > { %v4205_v55 = vpop.eup %4204 }
 0x2e7   : > { %v888_v56 = vsel %vm724_vm3, %v4205_v55, 0.0  ;;  %v1106_v61 = vmul.f32 1.442695, %v1105_v60 }
 0x2e8   : > { %889 = vadd.xlane.f32.xlu1 %v888_v56 }
 0x2e9   : > { %4208 = vpow2.f32 %v1106_v61 }
 0x2ee   : > { %v4207_v57 = vpop.eup %4206 }
 0x2ef   : > { %v998_v58 = vsel %vm724_vm3, %v4207_v57, 0.0 }
 0x2f0   : > { %999 = vadd.xlane.f32.xlu0 %v998_v58 }
 0x2f6   : > { %v4209_v62 = vpop.eup %4208 }
 0x2f7   : > { %v1108_v63 = vsel %vm724_vm3, %v4209_v62, 0.0 }
 0x2f9   : > { %894 = vrot.lane.b32.xlu1 %v4564_v10, %s4325_s12  ;;  %s5049_s12 = scalar_lea.vmem %s4996_s6, %s4480_s30  ;;  %s4333_s30 = smov [#allocation2]  }
 0x306   : > { %783 = vrot.lane.b32.xlu0 %v4564_v10, %s4326_s25 }
 0x30a   : > { %1114 = vrot.lane.b32.xlu0 %v4564_v10, %s4327_s15 }
 0x31d   : > { %1109 = vadd.xlane.f32.xlu1 %v1108_v63  ;;  %v1294_v63 = vld [vmem:[%s4519_s3 + $0x80] sm:$0xff] }
 0x32e   : > { %1004 = vrot.lane.b32.xlu1 %v4564_v10, %s4328_s20 }
 0x369   : > { %v779_v0 = vpop.xlane.xlu0 %778 }
 0x36a   : > { %4210 = vrcp.f32 %v779_v0  ;;  %v1302_v0 = vld [vmem:[%s4519_s3 + $0xc0] sm:$0xff] }
 0x371   : > { %v890_v1 = vpop.xlane.xlu1 %889 }
 0x372   : > { %4212 = vrcp.f32 %v890_v1  ;;  %v1295_v1 = vld [vmem:[%s4519_s3 + $0x88] sm:$0xff] }
 0x375   : > { %v895_v9 = vpop.permute.xlu1 %894 }
 0x376   : > { %v900_v13 = vsel %vm788_vm4, %v895_v9, 0  ;;  %v1286_v9 = vld [vmem:[%s4519_s3 + $0x40] sm:$0xff] }
 0x377   : > { %v4211_v3 = vpop.eup %4210 }
 0x378   : > { %v781_v6 = vmul.f32 %v4211_v3, %v4203_v52  ;;  %v1303_v3 = vld [vmem:[%s4519_s3 + $0xc8] sm:$0xff] }
 0x379   : > { %v1000_v5 = vpop.xlane.xlu0 %999 }
 0x37a   : > { %v782_v11 = vpack.c.bf16 %v781_v6, %v781_v6  ;;  %4214 = vrcp.f32 %v1000_v5  ;;  %v3557_v5 = vcombine.low %v1294_v63, %v1302_v0  ;;  %v3559_v6 = vcombine.low %v1295_v1, %v1303_v3 }
 0x37d   : > { %v784_v7 = vpop.permute.xlu0 %783 }
 0x37e   : > { %v790_v8 = vsel %vm788_vm4, %v784_v7, 0  ;;  %v3560_v7 = vcombine.high %v1295_v1, %v1303_v3  ;;  %v1292_v1 = vld [vmem:[%s4519_s3 + $0x70] sm:$0xff]  ;;  %v1293_v3 = vld [vmem:[%s4519_s3 + $0x78] sm:$0xff] }
 0x37f   : > { %3933 = vmatpush3.bf16.msra.mxu0 %v790_v8  ;;  %v4213_v12 = vpop.eup %4212  ;;  %v1278_v8 = vld [vmem:[%s4519_s3] sm:$0xff] }
 0x380   : > { %3944 = vmatprep.subr.bf16.mxu0 %v4316_v2  ;;  %v892_v10 = vmul.f32 %v4213_v12, %v4205_v55  ;;  %1610 = vmatprep.subr.bf16.mxu1 %v3560_v7  ;;  %v3542_v12 = vcombine.high %v1278_v8, %v1286_v9 }
 0x381   : > { %v1115_v20 = vpop.permute.xlu0 %1114 }
 0x382   : > { %3935 = vmatmul.mubr.msk.bf16.vlgmr.msra.gmra.mxu0 %vm724_vm3, %v782_v11  ;;  %v893_v14 = vpack.c.bf16 %v892_v10, %v892_v10  ;;  %v1120_v22 = vsel %vm788_vm4, %v1115_v20, 0  ;;  %v1279_v11 = vld [vmem:[%s4519_s3 + $0x8] sm:$0xff]  ;;  %v3541_v10 = vcombine.low %v1278_v8, %v1286_v9  ;;  %v1305_v20 = vld [vmem:[%s4519_s3 + $0xd8] sm:$0xff] }
 0x383   : > { %3945 = vmatpush3.bf16.msra.mxu0 %v900_v13  ;;  %3946 = vmatprep.mubr.msk.bf16.mxu0 %vm4317_vm1, %v4316_v2  ;;  %v1287_v13 = vld [vmem:[%s4519_s3 + $0x48] sm:$0xff] }
 0x384   : > { %3956 = vmatprep.subr.bf16.mxu0 %v4316_v2 }
 0x387   : > { %v4215_v15 = vpop.eup %4214 }
 0x388   : > { %v1002_v17 = vmul.f32 %v4215_v15, %v4207_v57  ;;  %v3544_v15 = vcombine.high %v1279_v11, %v1287_v13 }
 0x38a   : > { %3947 = vmatmul.mubr.msk.bf16.vlgmr.msra.gmra.mxu0 %vm724_vm3, %v893_v14  ;;  %v1003_v21 = vpack.c.bf16 %v1002_v17, %v1002_v17  ;;  %v3543_v14 = vcombine.low %v1279_v11, %v1287_v13  ;;  %v1304_v17 = vld [vmem:[%s4519_s3 + $0xd0] sm:$0xff]  ;;  %v4075_v13 = vld [vmem:[%s4525_s23 + $0xf8] sm:$0xff]  }
 0x38b   : > { %3958 = vmatprep.mubr.msk.bf16.mxu0 %vm4317_vm1, %v4316_v2 }
 0x3a6   : > { %v1110_v16 = vpop.xlane.xlu1 %1109 }
 0x3a7   : > { %4216 = vrcp.f32 %v1110_v16  ;;  %v1296_v16 = vld [vmem:[%s4519_s3 + $0x90] sm:$0xff] }
 0x3aa   : > { %v1005_v18 = vpop.permute.xlu1 %1004 }
 0x3ab   : > { %v1010_v19 = vsel %vm788_vm4, %v1005_v18, 0  ;;  %v1297_v18 = vld [vmem:[%s4519_s3 + $0x98] sm:$0xff] }
 0x3ac   : > { %3957 = vmatpush3.bf16.msra.mxu0 %v1010_v19  ;;  %v3562_v19 = vcombine.high %v1296_v16, %v1304_v17 }
 0x3ad   : > { %3968 = vmatprep.subr.bf16.mxu0 %v4316_v2 }
 0x3af   : > { %3959 = vmatmul.mubr.msk.bf16.vlgmr.msra.gmra.mxu0 %vm724_vm3, %v1003_v21  ;;  %v4332_v21 = vmov 0  }
 0x3b0   : > { %3969 = vmatpush3.bf16.msra.mxu0 %v1120_v22  ;;  %3970 = vmatprep.mubr.msk.bf16.mxu0 %vm4317_vm1, %v4316_v2  ;;  %v3561_v22 = vcombine.low %v1296_v16, %v1304_v17  ;;  %v4079_v16 = vld [vmem:[%s4525_s23 + $0xf0] sm:$0xff]  }
 0x3b1   : > { %v4080_v17 = vld [vmem:[%s4525_s23 + $0x30] sm:$0xff]  }
 0x3b4   : > { %v4217_v23 = vpop.eup %4216 }
 0x3b5   : > { %v1112_v24 = vmul.f32 %v4217_v23, %v4209_v62  ;;  %v3563_v23 = vcombine.low %v1297_v18, %v1305_v20 }
 0x3b7   : > { %v1113_v25 = vpack.c.bf16 %v1112_v24, %v1112_v24  ;;  %v3564_v24 = vcombine.high %v1297_v18, %v1305_v20  ;;  %v4081_v18 = vld [vmem:[%s4525_s23 + $0xb0] sm:$0xff]   ;;  %v4083_v20 = vld [vmem:[%s4525_s23 + $0xe8] sm:$0xff]  }
 0x3b9   : > { %3971 = vmatmul.mubr.msk.bf16.vlgmr.msra.gmra.mxu0 %vm724_vm3, %v1113_v25 }
 0x3ba   : > { %1589 = vmatprep.mubr.bf16.mxu0 %v4332_v21 }
 0x442   : > { %v826_v26 = vpop.f32.mrf.mxu0 }
 0x444   : > { %v3936_v27 = vpop.f32.mrf.mxu0 }
 0x446   : > { %v829_v28 = vpop.f32.mrf.mxu0 }
 0x448   : > { %v3937_v29 = vpop.f32.mrf.mxu0 }
 0x449   : > { %v3539_v29 = vld [vmem:[%s5048_s28] ss:$0 sm:$0xff] }
 0x44a   : > { %v936_v30 = vpop.f32.mrf.mxu0 }
 0x44b   : > { %1163 = vrot.lane.b32.xlu1 %v936_v30, %s4329_s0 }
 0x44c   : > { %v3948_v31 = vpop.f32.mrf.mxu0 }
 0x44d   : > { %v3540_v31 = vld [vmem:[%s5049_s12] ss:$0 sm:$0xff] }
 0x44e   : > { %v939_v32 = vpop.f32.mrf.mxu0 }
 0x450   : > { %v3949_v33 = vpop.f32.mrf.mxu0 }
 0x451   : > { %v1280_v33 = vld [vmem:[%s4519_s3 + $0x10] sm:$0xff] }
 0x46f   : > { %v1046_v36 = vpop.f32.mrf.mxu0 }
 0x470   : > { %1167 = vrot.lane.b32.xlu0 %v1046_v36, %s4330_s8  ;;  %v1289_v36 = vld [vmem:[%s4519_s3 + $0x58] sm:$0xff] }
 0x471   : > { %v3960_v37 = vpop.f32.mrf.mxu0 }
 0x473   : > { %v1049_v38 = vpop.f32.mrf.mxu0 }
 0x475   : > { %v3961_v39 = vpop.f32.mrf.mxu0 }
 0x476   : > { %v3546_v39 = vcombine.high %v1280_v33, %v1288_v34 }
 0x479   : > { %v1156_v40 = vpop.f32.mrf.mxu0 }
 0x47a   : > { %1171 = vrot.lane.b32.xlu1 %v1156_v40, %s4331_s14  ;;  %v3548_v40 = vcombine.high %v1281_v35, %v1289_v36 }
 0x47b   : > { %v3972_v41 = vpop.f32.mrf.mxu0 }
 0x47c   : > { %v1298_v41 = vld [vmem:[%s4519_s3 + $0xa0] sm:$0xff] }
 0x47d   : > { %v1159_v42 = vpop.f32.mrf.mxu0 }
 0x47e   : > { %v1306_v42 = vld [vmem:[%s4519_s3 + $0xe0] sm:$0xff] }
 0x47f   : > { %v3973_v43 = vpop.f32.mrf.mxu0 }
 0x480   : > { %v1299_v43 = vld [vmem:[%s4519_s3 + $0xa8] sm:$0xff] }
 0x4bd   : > { %v1164_v44 = vpop.permute.xlu1 %1163 }
 0x4be   : > { %v1174_v2 = vsel %vm724_vm3, %v826_v26, %v1164_v44  ;;  %v1307_v44 = vld [vmem:[%s4519_s3 + $0xe8] sm:$0xff] }
 0x4e2   : > { %v1168_v45 = vpop.permute.xlu0 %1167 }
 0x4e3   : > { %v1176_v46 = vsel %vm1175_vm5, %v1174_v2, %v1168_v45  ;;  %v3545_v45 = vcombine.low %v1280_v33, %v1288_v34  ;;  %v3547_v2 = vcombine.low %v1281_v35, %v1289_v36  ;;  %v4096_v33 = vld [vmem:[%s4525_s23 + $0x10] sm:$0xff]   ;;  %v4098_v35 = vld [vmem:[%s4525_s23 + $0x48] sm:$0xff]  }
 0x4e4   : > { %v4097_v34 = vld [vmem:[%s4525_s23 + $0x90] sm:$0xff]   ;;  %v4099_v36 = vld [vmem:[%s4525_s23 + $0xc8] sm:$0xff]  }
 0x4ec   : > { %v1172_v47 = vpop.permute.xlu1 %1171 }
 0x4ed   : > { %v1178_v48 = vsel %vm1177_vm6, %v1176_v46, %v1172_v47  ;;  %v3566_v46 = vcombine.high %v1298_v41, %v1306_v42  ;;  %v3568_v47 = vcombine.high %v1299_v43, %v1307_v44 }
 0x4ee   : > { %v1179_v49 = vpack.c.bf16 %v1178_v48, %v1178_v48  ;;  %v1282_v48 = vld [vmem:[%s4519_s3 + $0x20] sm:$0xff] }
 0x4f0   : > { %3979 = vmatmul.mubr.msk.bf16.vlgmr.msra.gmra.mxu1 %vm676_vm2, %v1179_v49  ;;  %v1290_v49 = vld [vmem:[%s4519_s3 + $0x60] sm:$0xff] }
 0x4f1   : > { %1611 = vmatpush1.bf16.msra.mxu1 %v3559_v6  ;;  %1630 = vmatprep.mubr.bf16.mxu1 %v4332_v21 }
 0x4f2   : > { %1612 = vmatprep.subr.bf16.mxu1 %v3544_v15  ;;  %v4078_v15 = vld [vmem:[%s4525_s23 + $0x70] sm:$0xff]  }
 0x4f5   : > { %1613 = vmatpush1.bf16.msra.mxu1 %v3543_v14  ;;  %v4077_v14 = vld [vmem:[%s4525_s23 + $0xb8] sm:$0xff]  }
 0x4f6   : > { %1692 = vmatprep.subr.bf16.mxu1 %v3564_v24  ;;  %v4087_v24 = vld [vmem:[%s4525_s23 + $0xe0] sm:$0xff]  }
 0x5b0   : > { %v1240_v51 = vpop.f32.mrf.mxu1 }
 0x5b1   : > { %v1241_v52 = vadd.f32 %v3535_v50, %v1240_v51  ;;  %v1283_v50 = vld [vmem:[%s4519_s3 + $0x28] sm:$0xff] }
 0x5b2   : > { %v3980_v53 = vpop.f32.mrf.mxu1  ;;  %v1291_v51 = vld [vmem:[%s4519_s3 + $0x68] sm:$0xff] }
 0x5b3   : > { %v1246_v54 = vadd.f32 %v1241_v52, %v4548_v4  ;;  %v3558_v4 = vcombine.high %v1294_v63, %v1302_v0  ;;  %v3565_v52 = vcombine.low %v1298_v41, %v1306_v42  ;;  %v3567_v53 = vcombine.low %v1299_v43, %v1307_v44  ;;  %v1284_v0 = vld [vmem:[%s4519_s3 + $0x30] sm:$0xff]  ;;  %v4103_v41 = vld [vmem:[%s4525_s23 + $0xc0] sm:$0xff]   ;;  %v4106_v44 = vld [vmem:[%s4525_s23 + $0x178] sm:$0xff]  }
 0x5b4   : > { %v1243_v55 = vpop.f32.mrf.mxu1  ;;  %v3554_v7 = vcombine.high %v1284_v0, %v1292_v1  ;;  %v3553_v9 = vcombine.low %v1284_v0, %v1292_v1  ;;  %v4104_v42 = vld [vmem:[%s4525_s23] sm:$0xff]  }
 0x5b5   : > { %v1249_v56 = vsel %vm676_vm2, %v1246_v54, 0.0  ;;  %1569 = vmatprep.subr.bf16.mxu0 %v3558_v4  ;;  %v3552_v55 = vcombine.high %v1283_v50, %v1291_v51  ;;  %v1285_v4 = vld [vmem:[%s4519_s3 + $0x38] sm:$0xff]  ;;  %v4105_v43 = vld [vmem:[%s4525_s23 + $0x80] sm:$0xff]  }
 0x5b6   : > { %1250 = vadd.xlane.f32.xlu0 %v1249_v56  ;;  %v3981_v57 = vpop.f32.mrf.mxu1  ;;  %1570 = vmatpush1.bf16.msra.mxu0 %v3557_v5  ;;  %v1300_v56 = vld [vmem:[%s4519_s3 + $0xb0] sm:$0xff]  ;;  %v3556_v8 = vcombine.high %v1285_v4, %v1293_v3  ;;  %v3555_v11 = vcombine.low %v1285_v4, %v1293_v3 }
 0x5b7   : > { %1571 = vmatprep.subr.bf16.mxu0 %v3542_v12  ;;  %v1308_v57 = vld [vmem:[%s4519_s3 + $0xf0] sm:$0xff]  ;;  %v4074_v12 = vld [vmem:[%s4525_s23 + $0x78] sm:$0xff]  }
 0x5b8   : > { %v3569_v5 = vcombine.low %v1300_v56, %v1308_v57 }
 0x5ba   : > { %1572 = vmatpush1.bf16.msra.mxu0 %v3541_v10  ;;  %v4076_v10 = vld [vmem:[%s4525_s23 + $0x38] sm:$0xff]  }
 0x5bb   : > { %1651 = vmatprep.subr.bf16.mxu0 %v3562_v19  ;;  %v4082_v19 = vld [vmem:[%s4525_s23 + $0x68] sm:$0xff]  }
 0x63f   : > { %v1251_v58 = vpop.xlane.xlu0 %1250 }
 0x640   : > { %v1253_v59 = vmul.f32 0.03125, %v1251_v58  ;;  %v1301_v58 = vld [vmem:[%s4519_s3 + $0xb8] sm:$0xff] }
 0x642   : > { %v1254_v60 = vsub.f32 %v1246_v54, %v1253_v59  ;;  %v3550_v54 = vcombine.high %v1282_v48, %v1290_v49  ;;  %v1309_v59 = vld [vmem:[%s4519_s3 + $0xf8] sm:$0xff] }
 0x643   : > { %v3572_v63 = vcombine.high %v1301_v58, %v1309_v59  ;;  %v3571_v6 = vcombine.low %v1301_v58, %v1309_v59 }
 0x644   : > { %v1255_v61 = vmul.f32 %v1254_v60, %v1254_v60 }
 0x646   : > { %v1256_v62 = vsel %vm676_vm2, %v1255_v61, 0.0  ;;  %v3551_v61 = vcombine.low %v1283_v50, %v1291_v51 }
 0x647   : > { %1257 = vadd.xlane.f32.xlu1 %v1256_v62  ;;  %v3570_v62 = vcombine.high %v1300_v56, %v1308_v57 }
 0x6d0   : > { %v1258_v25 = vpop.xlane.xlu1 %1257 }
 0x6d1   : > { %v1259_v26 = vmul.f32 0.03125, %v1258_v25  ;;  %v4088_v25 = vld [vmem:[%s4525_s23 + $0x20] sm:$0xff]  }
 0x6d3   : > { %v1260_v27 = vadd.f32 1e-05, %v1259_v26  ;;  %v4089_v26 = vld [vmem:[%s4525_s23 + $0xa0] sm:$0xff]  }
 0x6d5   : > { %4218 = vrsqrt.f32 %v1260_v27  ;;  %v4090_v27 = vld [vmem:[%s4525_s23 + $0x58] sm:$0xff]  }
 0x6e2   : > { %v4219_v28 = vpop.eup %4218 }
 0x6e3   : > { %v1262_v30 = vmul.f32 %v4219_v28, %v1254_v60  ;;  %v3549_v60 = vcombine.low %v1282_v48, %v1290_v49  ;;  %v4091_v28 = vld [vmem:[%s4525_s23 + $0xd8] sm:$0xff]   ;;  %v4746_v48 = vld [vmem:[%s4514_s13 + $0x8] sm:$0xff] }
 0x6e5   : > { %v1269_v32 = vmul.f32 %v3539_v29, %v1262_v30  ;;  %v4092_v29 = vld [vmem:[%s4525_s23 + $0x18] sm:$0xff]  }
 0x6e6   : > { %v4093_v30 = vld [vmem:[%s4525_s23 + $0x98] sm:$0xff]  }
 0x6e7   : > { %v4664_v37 = vadd.f32 %v3540_v31, %v1269_v32  ;;  %v4094_v31 = vld [vmem:[%s4525_s23 + $0x50] sm:$0xff]  }
 0x6e8   : > { %v4095_v32 = vld [vmem:[%s4525_s23 + $0xd0] sm:$0xff]  }
 0x6e9   : > { %v4668_v38 = vpack.c.bf16 %v4664_v37, %v4664_v37 }
 0x6eb   : > { %3573 = vmatmul.mubr.msk.bf16.vlgmr.msra.gmra.mxu0 %vm676_vm2, %v4668_v38  ;;  %3574 = vmatmul.mubr.msk.bf16.vlgmr.msra.gmra.mxu1 %vm676_vm2, %v4668_v38 }
 0x6ec   : > { %1652 = vmatpush1.bf16.msra.mxu0 %v3561_v22  ;;  %1693 = vmatpush1.bf16.msra.mxu1 %v3563_v23  ;;  %v4085_v22 = vld [vmem:[%s4525_s23 + $0xa8] sm:$0xff]   ;;  %v4086_v23 = vld [vmem:[%s4525_s23 + $0x60] sm:$0xff]  }
 0x6ed   : > { %1653 = vmatprep.subr.bf16.mxu0 %v3546_v39  ;;  %1694 = vmatprep.subr.bf16.mxu1 %v3548_v40  ;;  %v4101_v39 = vld [vmem:[%s4525_s23 + $0x88] sm:$0xff]   ;;  %v4102_v40 = vld [vmem:[%s4525_s23 + $0x40] sm:$0xff]  }
 0x6ee   : > { %1671 = vmatprep.mubr.bf16.mxu0 %v4332_v21  ;;  %1712 = vmatprep.mubr.bf16.mxu1 %v4332_v21 }
 0x6f0   : > { %1654 = vmatpush1.bf16.msra.mxu0 %v3545_v45  ;;  %1695 = vmatpush1.bf16.msra.mxu1 %v3547_v2  ;;  %v4107_v45 = vld [vmem:[%s4525_s23 + $0x1f8] sm:$0xff]   ;;  %v1314_v2 = vlaneseq }
 0x6f1   : > { %1733 = vmatprep.subr.bf16.mxu0 %v3566_v46  ;;  %1774 = vmatprep.subr.bf16.mxu1 %v3568_v47 }
 0x6f2   : > { %v4742_v46 = vshrl.u32 %v1314_v2, 7 }
 0x6f3   : > { %3575 = vmatmul.mubr.msk.bf16.vlgmr.msra.gmra.mxu0 %vm676_vm2, %v4668_v38  ;;  %3576 = vmatmul.mubr.msk.bf16.vlgmr.msra.gmra.mxu1 %vm676_vm2, %v4668_v38 }
 0x6f4   : > { %1734 = vmatpush1.bf16.msra.mxu0 %v3565_v52  ;;  %1775 = vmatpush1.bf16.msra.mxu1 %v3567_v53  ;;  %v1340_v47 = vsub.s32 6, %v4742_v46  ;;  %v1316_v50 = vsub.s32 0, %v4742_v46  ;;  %v1324_v51 = vsub.s32 2, %v4742_v46  ;;  %v4756_v52 = vld [vmem:[%s4514_s13] sm:$0xff]  ;;  %v1320_v53 = vsub.s32 1, %v4742_v46 }
 0x6f5   : > { %1735 = vmatprep.subr.bf16.mxu0 %v3550_v54  ;;  %1776 = vmatprep.subr.bf16.mxu1 %v3552_v55  ;;  %v1328_v54 = vsub.s32 3, %v4742_v46  ;;  %v1336_v3 = vsub.s32 5, %v4742_v46 }
 0x6f6   : > { %1753 = vmatprep.mubr.bf16.mxu0 %v4332_v21  ;;  %1794 = vmatprep.mubr.bf16.mxu1 %v4332_v21  ;;  %v4751_v49 = vrot.slane %v4746_v48, %v1340_v47  ;;  %v1317_v55 = vrot.slane %v4756_v52, %v1316_v50  ;;  %v1325_v56 = vrot.slane %v4756_v52, %v1324_v51 }
 0x6f7   : > { %v1321_v57 = vrot.slane %v4756_v52, %v1320_v53  ;;  %v1329_v58 = vrot.slane %v4756_v52, %v1328_v54 }
 0x6f8   : > { %1736 = vmatpush1.bf16.msra.mxu0 %v3549_v60  ;;  %1777 = vmatpush1.bf16.msra.mxu1 %v3551_v61 }
 0x6f9   : > { %1815 = vmatprep.subr.bf16.mxu0 %v3570_v62  ;;  %1856 = vmatprep.subr.bf16.mxu1 %v3572_v63 }
 0x6fb   : > { %3577 = vmatmul.mubr.msk.bf16.vlgmr.msra.gmra.mxu0 %vm676_vm2, %v4668_v38  ;;  %3578 = vmatmul.mubr.msk.bf16.vlgmr.msra.gmra.mxu1 %vm676_vm2, %v4668_v38 }
 0x6fc   : > { %1816 = vmatpush1.bf16.msra.mxu0 %v3569_v5  ;;  %1857 = vmatpush1.bf16.msra.mxu1 %v3571_v6  ;;  %v1344_v5 = vsub.s32 7, %v4742_v46 }
 0x6fd   : > { %1817 = vmatprep.subr.bf16.mxu0 %v3554_v7  ;;  %1858 = vmatprep.subr.bf16.mxu1 %v3556_v8 }
 0x6fe   : > { %1835 = vmatprep.mubr.bf16.mxu0 %v4332_v21  ;;  %1876 = vmatprep.mubr.bf16.mxu1 %v4332_v21  ;;  %v4084_v21 = vld [vmem:[%s4525_s23 + $0x28] sm:$0xff]  }
 0x700   : > { %1818 = vmatpush1.bf16.msra.mxu0 %v3553_v9  ;;  %1859 = vmatpush1.bf16.msra.mxu1 %v3555_v11 }
 0x701   : > { %3742 = vmatprep.subr.bf16.mxu0 %v4074_v12  ;;  %3764 = vmatprep.subr.bf16.mxu1 %v4075_v13 }
 0x703   : > { %3579 = vmatmul.mubr.msk.bf16.vlgmr.msra.gmra.mxu0 %vm676_vm2, %v4668_v38  ;;  %3580 = vmatmul.mubr.msk.bf16.vlgmr.msra.gmra.mxu1 %vm676_vm2, %v4668_v38  ;;  %v4100_v38 = vld [vmem:[%s4525_s23 + $0x8] sm:$0xff]  }
 0x704   : > { %3743 = vmatpush3.bf16.msra.mxu0 %v4076_v10  ;;  %3765 = vmatpush3.bf16.msra.mxu1 %v4077_v14 }
 0x705   : > { %3744 = vmatprep.subr.bf16.mxu0 %v4078_v15  ;;  %3766 = vmatprep.subr.bf16.mxu1 %v4079_v16  ;;  %v1337_v16 = vrot.slane %v4756_v52, %v1336_v3 }
 0x708   : > { %3745 = vmatpush3.bf16.msra.mxu0 %v4080_v17  ;;  %3767 = vmatpush3.bf16.msra.mxu1 %v4081_v18  ;;  %v1345_v17 = vrot.slane %v4756_v52, %v1344_v5  ;;  %v4108_v18 = vld [vmem:[%s4525_s23 + $0x138] sm:$0xff]  }
 0x709   : > { %3746 = vmatprep.subr.bf16.mxu0 %v4082_v19  ;;  %3768 = vmatprep.subr.bf16.mxu1 %v4083_v20  ;;  %v4109_v19 = vld [vmem:[%s4525_s23 + $0x1b8] sm:$0xff]  }
 0x70c   : > { %3747 = vmatpush3.bf16.msra.mxu0 %v4084_v21  ;;  %3769 = vmatpush3.bf16.msra.mxu1 %v4085_v22 }
 0x70d   : > { %3748 = vmatprep.subr.bf16.mxu0 %v4086_v23  ;;  %3770 = vmatprep.subr.bf16.mxu1 %v4087_v24  ;;  %v4110_v24 = vld [vmem:[%s4525_s23 + $0x170] sm:$0xff]  }
 0x710   : > { %3749 = vmatpush3.bf16.msra.mxu0 %v4088_v25  ;;  %3771 = vmatpush3.bf16.msra.mxu1 %v4089_v26  ;;  %v4111_v25 = vld [vmem:[%s4525_s23 + $0x1f0] sm:$0xff]  }
 0x711   : > { %3750 = vmatprep.subr.bf16.mxu0 %v4090_v27  ;;  %3772 = vmatprep.subr.bf16.mxu1 %v4091_v28 }
 0x714   : > { %3751 = vmatpush3.bf16.msra.mxu0 %v4092_v29  ;;  %3773 = vmatpush3.bf16.msra.mxu1 %v4093_v30  ;;  %v4112_v30 = vld [vmem:[%s4525_s23 + $0x130] sm:$0xff]  }
 0x715   : > { %3752 = vmatprep.subr.bf16.mxu0 %v4094_v31  ;;  %3774 = vmatprep.subr.bf16.mxu1 %v4095_v32  ;;  %v4113_v31 = vld [vmem:[%s4525_s23 + $0x1b0] sm:$0xff]  }
 0x718   : > { %3753 = vmatpush3.bf16.msra.mxu0 %v4096_v33  ;;  %3775 = vmatpush3.bf16.msra.mxu1 %v4097_v34  ;;  %v4114_v34 = vld [vmem:[%s4525_s23 + $0x168] sm:$0xff]  }
 0x719   : > { %3754 = vmatprep.subr.bf16.mxu0 %v4098_v35  ;;  %3776 = vmatprep.subr.bf16.mxu1 %v4099_v36  ;;  %v4115_v35 = vld [vmem:[%s4525_s23 + $0x1e8] sm:$0xff]  }
 0x71c   : > { %3755 = vmatpush3.bf16.msra.mxu0 %v4100_v38  ;;  %3777 = vmatpush3.bf16.msra.mxu1 %v4101_v39 }
 0x71d   : > { %3756 = vmatprep.subr.bf16.mxu0 %v4102_v40  ;;  %3778 = vmatprep.subr.bf16.mxu1 %v4103_v41 }
 0x720   : > { %3757 = vmatpush3.bf16.msra.mxu0 %v4104_v42  ;;  %3779 = vmatpush3.bf16.msra.mxu1 %v4105_v43  ;;  %v4116_v43 = vld [vmem:[%s4525_s23 + $0x128] sm:$0xff]  }
 0x721   : > { %3786 = vmatprep.subr.bf16.mxu0 %v4106_v44  ;;  %3808 = vmatprep.subr.bf16.mxu1 %v4107_v45  ;;  %v4117_v44 = vld [vmem:[%s4525_s23 + $0x1a8] sm:$0xff]  }
 0x7ab   : > { %v1591_v59 = vpop.f32.mrf.mxu0  ;;  %v1632_v60 = vpop.f32.mrf.mxu1 }
 0x7ac   : > { %v1592_v61 = vadd.f32 %v1591_v59, %v1317_v55  ;;  %v1633_v62 = vadd.f32 %v1632_v60, %v1325_v56  ;;  %v4118_v55 = vld [vmem:[%s4525_s23 + $0x160] sm:$0xff]   ;;  %v1332_v59 = vsub.s32 4, %v4742_v46 }
 0x7ad   : > { %v1593_v63 = vpop.f32.mrf.mxu0  ;;  %v1634_v0 = vpop.f32.mrf.mxu1  ;;  %v4119_v56 = vld [vmem:[%s4525_s23 + $0x1e0] sm:$0xff]  }
 0x7ae   : > { %v1594_v1 = vadd.f32 %v1593_v63, %v1321_v57  ;;  %v1635_v4 = vadd.f32 %v1634_v0, %v1329_v58  ;;  %v1885_v6 = vmax.f32 %v1592_v61, 0.0  ;;  %v1887_v7 = vmax.f32 %v1633_v62, 0.0  ;;  %v4120_v60 = vld [vmem:[%s4525_s23 + $0x120] sm:$0xff]   ;;  %v4122_v0 = vld [vmem:[%s4525_s23 + $0x158] sm:$0xff]  }
 0x7af   : > { %v1595_v8 = vpop.f32.mrf.mxu0  ;;  %v1636_v9 = vpop.f32.mrf.mxu1  ;;  %v4121_v61 = vld [vmem:[%s4525_s23 + $0x1a0] sm:$0xff]  }
 0x7b0   : > { %v1886_v11 = vmax.f32 %v1594_v1, 0.0  ;;  %v1888_v12 = vmax.f32 %v1635_v4, 0.0  ;;  %v1901_v20 = vpack.c.bf16 %v1885_v6, %v1885_v6  ;;  %v1903_v21 = vpack.c.bf16 %v1887_v7, %v1887_v7  ;;  %v4123_v1 = vld [vmem:[%s4525_s23 + $0x1d8] sm:$0xff]  }
 0x7b1   : > { %v1596_v13 = vpop.f32.mrf.mxu0  ;;  %v1637_v10 = vpop.f32.mrf.mxu1  ;;  %v1365_v4 = vrot.slane %v4746_v48, %v1332_v59  ;;  %v4124_v8 = vld [vmem:[%s4525_s23 + $0x118] sm:$0xff]  }
 0x7b2   : > { %v1902_v14 = vpack.c.bf16 %v1886_v11, %v1886_v11  ;;  %v1904_v15 = vpack.c.bf16 %v1888_v12, %v1888_v12  ;;  %v4125_v9 = vld [vmem:[%s4525_s23 + $0x198] sm:$0xff]   ;;  %v4126_v13 = vld [vmem:[%s4525_s23 + $0x150] sm:$0xff]  }
 0x7b3   : > { %v4782_v22 = vpop.f32.mrf.mxu0  ;;  %v4784_v23 = vpop.f32.mrf.mxu1  ;;  %v4127_v10 = vld [vmem:[%s4525_s23 + $0x1d0] sm:$0xff]  }
 0x7b4   : > { %2980 = vmatprep.mubr.bf16.mxu0 %v1902_v14  ;;  %3020 = vmatprep.mubr.bf16.mxu1 %v1904_v15 }
 0x7b5   : > { %v1675_v26 = vpop.f32.mrf.mxu0  ;;  %v1716_v27 = vpop.f32.mrf.mxu1  ;;  %2981 = vmatmul.mubr.bf16.vlgmr.msra.gmra.mxu0 %v1901_v20  ;;  %3021 = vmatmul.mubr.bf16.vlgmr.msra.gmra.mxu1 %v1903_v21  ;;  %v1333_v20 = vrot.slane %v4756_v52, %v1332_v59  ;;  %v1341_v21 = vrot.slane %v4756_v52, %v1340_v47  ;;  %v4132_v47 = vld [vmem:[%s4525_s23 + $0x108] sm:$0xff]  }
 0x7b6   : > { %v1676_v28 = vadd.f32 %v1675_v26, %v1337_v16  ;;  %v1717_v29 = vadd.f32 %v1716_v27, %v1345_v17  ;;  %3787 = vmatpush3.bf16.msra.mxu0 %v4108_v18  ;;  %3809 = vmatpush3.bf16.msra.mxu1 %v4109_v19  ;;  %v4128_v18 = vld [vmem:[%s4525_s23 + $0x110] sm:$0xff]   ;;  %v4131_v26 = vld [vmem:[%s4525_s23 + $0x1c8] sm:$0xff]   ;;  %v1353_v27 = vrot.slane %v4746_v48, %v1320_v53  ;;  %v4134_v53 = vld [vmem:[%s4525_s23 + $0x140] sm:$0xff]  }
 0x7b7   : > { %v1677_v32 = vpop.f32.mrf.mxu0  ;;  %v1718_v33 = vpop.f32.mrf.mxu1  ;;  %3788 = vmatprep.subr.bf16.mxu0 %v4110_v24  ;;  %3810 = vmatprep.subr.bf16.mxu1 %v4111_v25  ;;  %v4129_v19 = vld [vmem:[%s4525_s23 + $0x190] sm:$0xff]   ;;  %v4133_v52 = vld [vmem:[%s4525_s23 + $0x188] sm:$0xff]  }
 0x7b8   : > { %v1890_v36 = vmax.f32 %v1676_v28, 0.0  ;;  %v1892_v38 = vmax.f32 %v1717_v29, 0.0  ;;  %v1361_v28 = vrot.slane %v4746_v48, %v1328_v54  ;;  %v1715_v32 = vadd.f32 %v4784_v23, %v1341_v21  ;;  %v4135_v33 = vld [vmem:[%s4525_s23 + $0x1c0] sm:$0xff]   ;;  %v4139_v23 = vld [vmem:[%s4525_s23 + $0x2f8] sm:$0xff]   ;;  %v4161_v21 = vld [vmem:[%s4525_s23 + $0x290] sm:$0xff]  }
 0x7b9   : > { %v1678_v39 = vpop.f32.mrf.mxu0  ;;  %v1719_v40 = vpop.f32.mrf.mxu1 }
 0x7ba   : > { %v1906_v41 = vpack.c.bf16 %v1890_v36, %v1890_v36  ;;  %v1908_v42 = vpack.c.bf16 %v1892_v38, %v1892_v38  ;;  %3789 = vmatpush3.bf16.msra.mxu0 %v4112_v30  ;;  %3811 = vmatpush3.bf16.msra.mxu1 %v4113_v31  ;;  %v1674_v31 = vadd.f32 %v4782_v22, %v1333_v20  ;;  %v4137_v36 = vld [vmem:[%s4525_s23 + $0x180] sm:$0xff]   ;;  %v1891_v39 = vmax.f32 %v1715_v32, 0.0  ;;  %v4138_v22 = vld [vmem:[%s4525_s23 + $0x278] sm:$0xff]  }
 0x7bb   : > { %v4794_v45 = vpop.f32.mrf.mxu0  ;;  %v4796_v2 = vpop.f32.mrf.mxu1  ;;  %3790 = vmatprep.subr.bf16.mxu0 %v4114_v34  ;;  %3812 = vmatprep.subr.bf16.mxu1 %v4115_v35  ;;  %v4136_v35 = vld [vmem:[%s4525_s23 + $0x100] sm:$0xff]   ;;  %v1349_v20 = vrot.slane %v4746_v48, %v1316_v50  ;;  %v1377_v50 = vrot.slane %v4746_v48, %v1344_v5 }
 0x7bc   : > { %3060 = vmatprep.mubr.bf16.mxu0 %v1906_v41  ;;  %3100 = vmatprep.mubr.bf16.mxu1 %v1908_v42  ;;  %v1889_v38 = vmax.f32 %v1674_v31, 0.0  ;;  %v4140_v42 = vld [vmem:[%s4525_s23 + $0x238] sm:$0xff]  }
 0x7bd   : > { %v1757_v57 = vpop.f32.mrf.mxu0  ;;  %v1798_v58 = vpop.f32.mrf.mxu1 }
 0x7be   : > { %3791 = vmatpush3.bf16.msra.mxu0 %v4116_v43  ;;  %3813 = vmatpush3.bf16.msra.mxu1 %v4117_v44  ;;  %v1758_v34 = vadd.f32 %v1757_v57, %v1353_v27  ;;  %v1799_v54 = vadd.f32 %v1798_v58, %v1361_v28  ;;  %v1905_v43 = vpack.c.bf16 %v1889_v38, %v1889_v38  ;;  %v4142_v57 = vld [vmem:[%s4525_s23 + $0x270] sm:$0xff]   ;;  %v4164_v27 = vld [vmem:[%s4525_s23 + $0x208] sm:$0xff]  }
 0x7bf   : > { %v1759_v62 = vpop.f32.mrf.mxu0  ;;  %v1800_v63 = vpop.f32.mrf.mxu1  ;;  %3792 = vmatprep.subr.bf16.mxu0 %v4118_v55  ;;  %3814 = vmatprep.subr.bf16.mxu1 %v4119_v56  ;;  %v1907_v44 = vpack.c.bf16 %v1891_v39, %v1891_v39  ;;  %v4141_v55 = vld [vmem:[%s4525_s23 + $0x2b8] sm:$0xff]   ;;  %v4143_v58 = vld [vmem:[%s4525_s23 + $0x2f0] sm:$0xff]   ;;  %v1756_v28 = vadd.f32 %v4794_v45, %v1349_v20  ;;  %v4169_v45 = vld [vmem:[%s4525_s23 + $0x280] sm:$0xff]  }
 0x7c0   : > { %v1894_v40 = vmax.f32 %v1758_v34, 0.0  ;;  %v1896_v41 = vmax.f32 %v1799_v54, 0.0  ;;  %v4146_v62 = vld [vmem:[%s4525_s23 + $0x268] sm:$0xff]   ;;  %v4174_v54 = vld [vmem:[%s4525_s23 + $0x370] sm:$0xff]  }
 0x7c1   : > { %v1760_v6 = vpop.f32.mrf.mxu0  ;;  %v1801_v7 = vpop.f32.mrf.mxu1  ;;  %v4147_v63 = vld [vmem:[%s4525_s23 + $0x2e8] sm:$0xff]   ;;  %v1893_v5 = vmax.f32 %v1756_v28, 0.0  ;;  %v4176_v39 = vld [vmem:[%s4525_s23 + $0x330] sm:$0xff]  }
 0x7c2   : > { %3793 = vmatpush3.bf16.msra.mxu0 %v4120_v60  ;;  %3815 = vmatpush3.bf16.msra.mxu1 %v4121_v61  ;;  %v1910_v56 = vpack.c.bf16 %v1894_v40, %v1894_v40  ;;  %v1912_v59 = vpack.c.bf16 %v1896_v41, %v1896_v41  ;;  %v4144_v60 = vld [vmem:[%s4525_s23 + $0x230] sm:$0xff]   ;;  %v4151_v6 = vld [vmem:[%s4525_s23 + $0x2e0] sm:$0xff]   ;;  %v4179_v40 = vld [vmem:[%s4525_s23 + $0x3e8] sm:$0xff]  }
 0x7c3   : > { %v1837_v11 = vpop.f32.mrf.mxu0  ;;  %v1878_v12 = vpop.f32.mrf.mxu1  ;;  %3794 = vmatprep.subr.bf16.mxu0 %v4122_v0  ;;  %3816 = vmatprep.subr.bf16.mxu1 %v4123_v1  ;;  %v4145_v61 = vld [vmem:[%s4525_s23 + $0x2b0] sm:$0xff]   ;;  %v4148_v0 = vld [vmem:[%s4525_s23 + $0x228] sm:$0xff]   ;;  %v4152_v7 = vld [vmem:[%s4525_s23 + $0x220] sm:$0xff]  }
 0x7c4   : > { %v4810_v14 = vadd.f32 %v1837_v11, %v1365_v4  ;;  %v4813_v15 = vadd.f32 %v1878_v12, %v4751_v49  ;;  %v4130_v49 = vld [vmem:[%s4525_s23 + $0x148] sm:$0xff]   ;;  %v4150_v4 = vld [vmem:[%s4525_s23 + $0x260] sm:$0xff]   ;;  %v4155_v11 = vld [vmem:[%s4525_s23 + $0x2d8] sm:$0xff]  }
 0x7c5   : > { %v4815_v16 = vpop.f32.mrf.mxu0  ;;  %v4817_v17 = vpop.f32.mrf.mxu1  ;;  %v4149_v1 = vld [vmem:[%s4525_s23 + $0x2a8] sm:$0xff]   ;;  %v4156_v12 = vld [vmem:[%s4525_s23 + $0x218] sm:$0xff]  }
 0x7c6   : > { %3795 = vmatpush3.bf16.msra.mxu0 %v4124_v8  ;;  %3817 = vmatpush3.bf16.msra.mxu1 %v4125_v9  ;;  %v4153_v8 = vld [vmem:[%s4525_s23 + $0x2a0] sm:$0xff]   ;;  %v4154_v9 = vld [vmem:[%s4525_s23 + $0x258] sm:$0xff]   ;;  %v4180_v41 = vld [vmem:[%s4525_s23 + $0x328] sm:$0xff]  }
 0x7c7   : > { %v1841_v24 = vpop.f32.mrf.mxu0  ;;  %v1882_v25 = vpop.f32.mrf.mxu1  ;;  %3796 = vmatprep.subr.bf16.mxu0 %v4126_v13  ;;  %3818 = vmatprep.subr.bf16.mxu1 %v4127_v10  ;;  %v4157_v13 = vld [vmem:[%s4525_s23 + $0x298] sm:$0xff]   ;;  %v4158_v10 = vld [vmem:[%s4525_s23 + $0x250] sm:$0xff]  }
 0x7c8   : > { %v4162_v24 = vld [vmem:[%s4525_s23 + $0x248] sm:$0xff]   ;;  %v1357_v25 = vrot.slane %v4746_v48, %v1324_v51 }
 0x7c9   : > { %v1842_v29 = vpop.f32.mrf.mxu0  ;;  %v1883_v30 = vpop.f32.mrf.mxu1  ;;  %v4165_v51 = vld [vmem:[%s4525_s23 + $0x288] sm:$0xff]  }
 0x7ca   : > { %3797 = vmatpush3.bf16.msra.mxu0 %v4128_v18  ;;  %3819 = vmatpush3.bf16.msra.mxu1 %v4129_v19  ;;  %v4159_v18 = vld [vmem:[%s4525_s23 + $0x2d0] sm:$0xff]   ;;  %v4166_v29 = vld [vmem:[%s4525_s23 + $0x240] sm:$0xff]   ;;  %v1797_v30 = vadd.f32 %v4796_v2, %v1357_v25  ;;  %v4171_v2 = vld [vmem:[%s4525_s23 + $0x3f8] sm:$0xff]  }
 0x7cb   : > { %3798 = vmatprep.subr.bf16.mxu0 %v4130_v49  ;;  %3820 = vmatprep.subr.bf16.mxu1 %v4131_v26  ;;  %v4160_v19 = vld [vmem:[%s4525_s23 + $0x210] sm:$0xff]   ;;  %v4163_v49 = vld [vmem:[%s4525_s23 + $0x2c8] sm:$0xff]   ;;  %v1369_v26 = vrot.slane %v4746_v48, %v1336_v3  ;;  %v1881_v48 = vadd.f32 %v4817_v17, %v1377_v50  ;;  %v4168_v3 = vld [vmem:[%s4525_s23 + $0x200] sm:$0xff]  }
 0x7cc   : > { %v1895_v31 = vmax.f32 %v1797_v30, 0.0  ;;  %v4173_v17 = vld [vmem:[%s4525_s23 + $0x3b8] sm:$0xff]  }
 0x7cd   : > { %v1840_v46 = vadd.f32 %v4815_v16, %v1369_v26  ;;  %v4172_v16 = vld [vmem:[%s4525_s23 + $0x338] sm:$0xff]  }
 0x7ce   : > { %3799 = vmatpush3.bf16.msra.mxu0 %v4132_v47  ;;  %3821 = vmatpush3.bf16.msra.mxu1 %v4133_v52  ;;  %v4167_v47 = vld [vmem:[%s4525_s23 + $0x2c0] sm:$0xff]   ;;  %v4170_v52 = vld [vmem:[%s4525_s23 + $0x378] sm:$0xff]   ;;  %v1911_v34 = vpack.c.bf16 %v1895_v31, %v1895_v31 }
 0x7cf   : > { %3800 = vmatprep.subr.bf16.mxu0 %v4134_v53  ;;  %3822 = vmatprep.subr.bf16.mxu1 %v4135_v33  ;;  %v1898_v32 = vmax.f32 %v1840_v46, 0.0  ;;  %v1900_v53 = vmax.f32 %v1881_v48, 0.0  ;;  %v1909_v33 = vpack.c.bf16 %v1893_v5, %v1893_v5 }
 0x7d1   : > { %v1916_v38 = vpack.c.bf16 %v1900_v53, %v1900_v53 }
 0x7d2   : > { %3801 = vmatpush3.bf16.msra.mxu0 %v4136_v35  ;;  %3823 = vmatpush3.bf16.msra.mxu1 %v4137_v36  ;;  %v1914_v35 = vpack.c.bf16 %v1898_v32, %v1898_v32  ;;  %v4175_v36 = vld [vmem:[%s4525_s23 + $0x3f0] sm:$0xff]  }
 0x7d3   : > { %3830 = vmatprep.subr.bf16.mxu0 %v4138_v22  ;;  %3852 = vmatprep.subr.bf16.mxu1 %v4139_v23  ;;  %v4177_v22 = vld [vmem:[%s4525_s23 + $0x3b0] sm:$0xff]   ;;  %v4178_v23 = vld [vmem:[%s4525_s23 + $0x368] sm:$0xff]  }
 0x7d5   : > { %3061 = vmatmul.mubr.bf16.vlgmr.msra.gmra.mxu0 %v1905_v43  ;;  %3101 = vmatmul.mubr.bf16.vlgmr.msra.gmra.mxu1 %v1907_v44  ;;  %v4182_v43 = vld [vmem:[%s4525_s23 + $0x360] sm:$0xff]  }
 0x7d6   : > { %3831 = vmatpush3.bf16.msra.mxu0 %v4140_v42  ;;  %3140 = vmatprep.mubr.bf16.mxu0 %v1910_v56  ;;  %v4181_v42 = vld [vmem:[%s4525_s23 + $0x3a8] sm:$0xff]   ;;  %v4183_v44 = vld [vmem:[%s4525_s23 + $0x3e0] sm:$0xff]  }
 0x7d7   : > { %3853 = vmatpush3.bf16.msra.mxu1 %v4141_v55  ;;  %3180 = vmatprep.mubr.bf16.mxu1 %v1912_v59  ;;  %v4184_v55 = vld [vmem:[%s4525_s23 + $0x320] sm:$0xff]   ;;  %v4188_v59 = vld [vmem:[%s4525_s23 + $0x318] sm:$0xff]  }
 0x7d8   : > { %3832 = vmatprep.subr.bf16.mxu0 %v4142_v57  ;;  %3854 = vmatprep.subr.bf16.mxu1 %v4143_v58  ;;  %v4185_v56 = vld [vmem:[%s4525_s23 + $0x3a0] sm:$0xff]   ;;  %v4186_v57 = vld [vmem:[%s4525_s23 + $0x358] sm:$0xff]  }
 0x7d9   : > { %v4187_v58 = vld [vmem:[%s4525_s23 + $0x3d8] sm:$0xff]  }
 0x7da   : > { %3833 = vmatpush3.bf16.msra.mxu0 %v4144_v60  ;;  %v4189_v60 = vld [vmem:[%s4525_s23 + $0x398] sm:$0xff]  }
 0x7db   : > { %3855 = vmatpush3.bf16.msra.mxu1 %v4145_v61  ;;  %3834 = vmatprep.subr.bf16.mxu0 %v4146_v62  ;;  %v4190_v61 = vld [vmem:[%s4525_s23 + $0x350] sm:$0xff]  }
 0x7dc   : > { %3856 = vmatprep.subr.bf16.mxu1 %v4147_v63  ;;  %v4191_v62 = vld [vmem:[%s4525_s23 + $0x3d0] sm:$0xff]  }
 0x7dd   : > { %v4192_v63 = vld [vmem:[%s4525_s23 + $0x310] sm:$0xff]  }
 0x7de   : > { %3835 = vmatpush3.bf16.msra.mxu0 %v4148_v0  ;;  %v4193_v0 = vld [vmem:[%s4525_s23 + $0x390] sm:$0xff]  }
 0x7df   : > { %3857 = vmatpush3.bf16.msra.mxu1 %v4149_v1  ;;  %3836 = vmatprep.subr.bf16.mxu0 %v4150_v4  ;;  %v4194_v1 = vld [vmem:[%s4525_s23 + $0x348] sm:$0xff]  }
 0x7e0   : > { %3858 = vmatprep.subr.bf16.mxu1 %v4151_v6  ;;  %v4195_v4 = vld [vmem:[%s4525_s23 + $0x3c8] sm:$0xff]  }
 0x7e1   : > { %v4196_v6 = vld [vmem:[%s4525_s23 + $0x308] sm:$0xff]  }
 0x7e2   : > { %3837 = vmatpush3.bf16.msra.mxu0 %v4152_v7  ;;  %v4197_v7 = vld [vmem:[%s4525_s23 + $0x388] sm:$0xff]  }
 0x7e3   : > { %3859 = vmatpush3.bf16.msra.mxu1 %v4153_v8  ;;  %3838 = vmatprep.subr.bf16.mxu0 %v4154_v9  ;;  %v4198_v8 = vld [vmem:[%s4525_s23 + $0x340] sm:$0xff]  }
 0x7e4   : > { %3860 = vmatprep.subr.bf16.mxu1 %v4155_v11  ;;  %v4199_v9 = vld [vmem:[%s4525_s23 + $0x3c0] sm:$0xff]  }
 0x7e5   : > { %v4200_v11 = vld [vmem:[%s4525_s23 + $0x300] sm:$0xff]  }
 0x7e6   : > { %3839 = vmatpush3.bf16.msra.mxu0 %v4156_v12  ;;  %v1897_v12 = vmax.f32 %v4810_v14, 0.0 }
 0x7e7   : > { %3861 = vmatpush3.bf16.msra.mxu1 %v4157_v13  ;;  %3840 = vmatprep.subr.bf16.mxu0 %v4158_v10  ;;  %v4201_v13 = vld [vmem:[%s4525_s23 + $0x380] sm:$0xff]   ;;  %v1899_v10 = vmax.f32 %v4813_v15, 0.0  ;;  %s5050_s23 = sld [smem:[#allocation9_spill]] }
 0x7e8   : > { %3862 = vmatprep.subr.bf16.mxu1 %v4159_v18  ;;  %v1913_v18 = vpack.c.bf16 %v1897_v12, %v1897_v12 }
 0x7ea   : > { %3841 = vmatpush3.bf16.msra.mxu0 %v4160_v19  ;;  %v1915_v19 = vpack.c.bf16 %v1899_v10, %v1899_v10 }
 0x7eb   : > { %3863 = vmatpush3.bf16.msra.mxu1 %v4161_v21  ;;  %3842 = vmatprep.subr.bf16.mxu0 %v4162_v24  ;;  %v3581_v24 = vld [vmem:[%s636_s27] ss:$0 sm:$0xff]  ;;  %s5051_s27 = sld [smem:[#allocation6_spill]] }
 0x7ec   : > { %3864 = vmatprep.subr.bf16.mxu1 %v4163_v49 }
 0x7ed   : > { %s3713_s29 = sshll.u32 %s5050_s23, 7 }
 0x7ee   : > { %3843 = vmatpush3.bf16.msra.mxu0 %v4164_v27  ;;  %s3311_s28 = scalar_lea.hbm %s5054_s24, %s3713_s29 }
 0x7ef   : > { %3865 = vmatpush3.bf16.msra.mxu1 %v4165_v51  ;;  %3844 = vmatprep.subr.bf16.mxu0 %v4166_v29 }
 0x7f0   : > { %3866 = vmatprep.subr.bf16.mxu1 %v4167_v47 }
 0x7f1   : > { %s5055_s18 = sand.u32 1, %s5051_s27  }
 0x7f2   : > { %3845 = vmatpush3.bf16.msra.mxu0 %v4168_v3  ;;  %s3300_s22 = scalar_lea.sflag [#allocation3], %s5055_s18 }
 0x7f3   : > { %3867 = vmatpush3.bf16.msra.mxu1 %v4169_v45  ;;  %3874 = vmatprep.subr.bf16.mxu0 %v4170_v52 }
 0x7f4   : > { %3896 = vmatprep.subr.bf16.mxu1 %v4171_v2 }
 0x7f5   : > { %3141 = vmatmul.mubr.bf16.vlgmr.msra.gmra.mxu0 %v1909_v33 }
 0x7f6   : > { %3181 = vmatmul.mubr.bf16.vlgmr.msra.gmra.mxu1 %v1911_v34  ;;  %3875 = vmatpush3.bf16.msra.mxu0 %v4172_v16 }
 0x7f7   : > { %3220 = vmatprep.mubr.bf16.mxu0 %v1914_v35  ;;  %3897 = vmatpush3.bf16.msra.mxu1 %v4173_v17 }
 0x7f8   : > { %3260 = vmatprep.mubr.bf16.mxu1 %v1916_v38  ;;  %3876 = vmatprep.subr.bf16.mxu0 %v4174_v54 }
 0x7f9   : > { %3898 = vmatprep.subr.bf16.mxu1 %v4175_v36 }
 0x7fa   : > { %3877 = vmatpush3.bf16.msra.mxu0 %v4176_v39 }
 0x7fb   : > { %3899 = vmatpush3.bf16.msra.mxu1 %v4177_v22  ;;  %3878 = vmatprep.subr.bf16.mxu0 %v4178_v23 }
 0x7fc   : > { %3900 = vmatprep.subr.bf16.mxu1 %v4179_v40 }
 0x7fe   : > { %3879 = vmatpush3.bf16.msra.mxu0 %v4180_v41 }
 0x7ff   : > { %3901 = vmatpush3.bf16.msra.mxu1 %v4181_v42  ;;  %3880 = vmatprep.subr.bf16.mxu0 %v4182_v43 }
 0x800   : > { %3902 = vmatprep.subr.bf16.mxu1 %v4183_v44 }
 0x802   : > { %3881 = vmatpush3.bf16.msra.mxu0 %v4184_v55 }
 0x803   : > { %3903 = vmatpush3.bf16.msra.mxu1 %v4185_v56  ;;  %3882 = vmatprep.subr.bf16.mxu0 %v4186_v57 }
 0x804   : > { %3904 = vmatprep.subr.bf16.mxu1 %v4187_v58 }
 0x806   : > { %3883 = vmatpush3.bf16.msra.mxu0 %v4188_v59 }
 0x807   : > { %3905 = vmatpush3.bf16.msra.mxu1 %v4189_v60  ;;  %3884 = vmatprep.subr.bf16.mxu0 %v4190_v61 }
 0x808   : > { %3906 = vmatprep.subr.bf16.mxu1 %v4191_v62 }
 0x80a   : > { %3885 = vmatpush3.bf16.msra.mxu0 %v4192_v63 }
 0x80b   : > { %3907 = vmatpush3.bf16.msra.mxu1 %v4193_v0  ;;  %3886 = vmatprep.subr.bf16.mxu0 %v4194_v1 }
 0x80c   : > { %3908 = vmatprep.subr.bf16.mxu1 %v4195_v4 }
 0x80e   : > { %3887 = vmatpush3.bf16.msra.mxu0 %v4196_v6 }
 0x80f   : > { %3909 = vmatpush3.bf16.msra.mxu1 %v4197_v7  ;;  %3888 = vmatprep.subr.bf16.mxu0 %v4198_v8 }
 0x810   : > { %3910 = vmatprep.subr.bf16.mxu1 %v4199_v9 }
 0x812   : > { %3889 = vmatpush3.bf16.msra.mxu0 %v4200_v11 }
 0x813   : > { %3911 = vmatpush3.bf16.msra.mxu1 %v4201_v13  ;;  %v3710_v13 = vld [vmem:[%s639_s16] ss:$0 sm:$0xff]  ;;  %s4222_s16 = scalar_lea.vmem %s3314_s21, 128 }
 0x814   : > { %p4223_p1 = scmp.ne.s32.totalorder %s3314_s21, %s4222_s16 }
 0x815   : > { %3221 = vmatmul.mubr.bf16.vlgmr.msra.gmra.mxu0 %v1913_v18  ;;  %v3711_v18 = vld [vmem:[%s642_s26] ss:$0 sm:$0xff]  ;;  %s4226_s26 = sshll.u32 %s4333_s30, 4  ;;  %s4227_s26 = int_to_ptr.vmem [resolvable:$false] %s4226_s26 }
 0x816   : > { %3261 = vmatmul.mubr.bf16.vlgmr.msra.gmra.mxu1 %v1915_v19  ;;  %p4224_p2 = pnand %p4223_p1, %p4453_p3  ;;  %s4228_s12 = scalar_lea.vmem %s4227_s26, 256 }
 0x817   : > { %p4229_p5 = scmp.lt.s32.totalorder %s3314_s21, %s4227_s26  ;;  %p4230_p6 = scmp.lt.s32.totalorder %s4228_s12, %s4222_s16 }
 0x818   : > { %p4225_p4 = pneg %p4224_p2 }
 0x819   : > { %p4231_p7 = por %p4230_p6, %p4229_p5 }
 0x81b   : > { %p4232_p8 = pnand %p4231_p7, %p4225_p4 }
 0x875   : > { %v3758_v20 = vpop.f32.mrf.mxu0  ;;  %v3780_v21 = vpop.f32.mrf.mxu1 }
 0x877   : > { %v3759_v14 = vpop.f32.mrf.mxu0  ;;  %v3781_v25 = vpop.f32.mrf.mxu1 }
 0x878   : > { %v3760_v49 = vadd.f32 %v3759_v14, %v3758_v20  ;;  %v3782_v26 = vadd.f32 %v3781_v25, %v3780_v21 }
 0x879   : > { %v3761_v50 = vpop.f32.mrf.mxu0  ;;  %v3783_v15 = vpop.f32.mrf.mxu1 }
 0x87a   : > { %v2983_v27 = vadd.f32 %v3760_v49, %v3581_v24 }
 0x87b   : > { %v3762_v28 = vpop.f32.mrf.mxu0  ;;  %v3784_v51 = vpop.f32.mrf.mxu1 }
 0x87c   : > { %v3023_v29 = vadd.f32 %v3782_v26, %v2983_v27 }
 0x895   : > { %v3802_v30 = vpop.f32.mrf.mxu0  ;;  %v3824_v47 = vpop.f32.mrf.mxu1 }
 0x897   : > { %v3803_v46 = vpop.f32.mrf.mxu0  ;;  %v3825_v48 = vpop.f32.mrf.mxu1 }
 0x898   : > { %v3804_v54 = vadd.f32 %v3803_v46, %v3802_v30  ;;  %v3826_v36 = vadd.f32 %v3825_v48, %v3824_v47 }
 0x899   : > { %v3805_v3 = vpop.f32.mrf.mxu0  ;;  %v3827_v5 = vpop.f32.mrf.mxu1 }
 0x89a   : > { %v3063_v35 = vadd.f32 %v3804_v54, %v3023_v29 }
 0x89b   : > { %v3806_v45 = vpop.f32.mrf.mxu0  ;;  %v3828_v52 = vpop.f32.mrf.mxu1 }
 0x89c   : > { %v3103_v39 = vadd.f32 %v3826_v36, %v3063_v35 }
 0x8b5   : > { %v3846_v31 = vpop.f32.mrf.mxu0 }
 0x8b6   : > { %v3868_v2 = vpop.f32.mrf.mxu1 }
 0x8b7   : > { %v3847_v32 = vpop.f32.mrf.mxu0 }
 0x8b8   : > { %v3869_v53 = vpop.f32.mrf.mxu1  ;;  %v3848_v38 = vadd.f32 %v3847_v32, %v3846_v31 }
 0x8b9   : > { %v3849_v16 = vpop.f32.mrf.mxu0  ;;  %v3870_v40 = vadd.f32 %v3869_v53, %v3868_v2 }
 0x8ba   : > { %v3871_v33 = vpop.f32.mrf.mxu1  ;;  %v3143_v22 = vadd.f32 %v3848_v38, %v3103_v39 }
 0x8bb   : > { %v3850_v17 = vpop.f32.mrf.mxu0 }
 0x8bc   : > { %v3872_v34 = vpop.f32.mrf.mxu1  ;;  %v3183_v43 = vadd.f32 %v3870_v40, %v3143_v22 }
 0x8d5   : > { %v3890_v23 = vpop.f32.mrf.mxu0 }
 0x8d6   : > { %v3912_v41 = vpop.f32.mrf.mxu1 }
 0x8d7   : > { %v3891_v42 = vpop.f32.mrf.mxu0 }
 0x8d8   : > { %v3892_v44 = vadd.f32 %v3891_v42, %v3890_v23  ;;  %v3913_v55 = vpop.f32.mrf.mxu1 }
 0x8d9   : > { %v3893_v56 = vpop.f32.mrf.mxu0  ;;  %v3914_v58 = vadd.f32 %v3913_v55, %v3912_v41 }
 0x8da   : > { %v3223_v57 = vadd.f32 %v3892_v44, %v3183_v43  ;;  %v3915_v59 = vpop.f32.mrf.mxu1 }
 0x8db   : > { %v3894_v60 = vpop.f32.mrf.mxu0 }
 0x8dc   : > { %v3263_v61 = vadd.f32 %v3914_v58, %v3223_v57  ;;  %v3916_v62 = vpop.f32.mrf.mxu1 }
 0x8de   : > { %v3268_v63 = vadd.f32 %v3263_v61, %v4664_v37 }
 0x8e0   : > { %v3271_v0 = vsel %vm676_vm2, %v3268_v63, 0.0 }
 0x8e1   : > { %3272 = vadd.xlane.f32.xlu0 %v3271_v0 }
 0x96a   : > { %v3273_v1 = vpop.xlane.xlu0 %3272 }
 0x96b   : > { %v3274_v4 = vmul.f32 0.03125, %v3273_v1 }
 0x96d   : > { %v3275_v6 = vsub.f32 %v3268_v63, %v3274_v4 }
 0x96f   : > { %v3276_v7 = vmul.f32 %v3275_v6, %v3275_v6 }
 0x971   : > { %v3277_v8 = vsel %vm676_vm2, %v3276_v7, 0.0 }
 0x972   : > { %3278 = vadd.xlane.f32.xlu0 %v3277_v8 }
 0x9fb   : > { %v3279_v9 = vpop.xlane.xlu0 %3278 }
 0x9fc   : > { %v3280_v11 = vmul.f32 0.03125, %v3279_v9 }
 0x9fe   : > { %v3281_v12 = vadd.f32 1e-05, %v3280_v11 }
 0xa00   : > { %4220 = vrsqrt.f32 %v3281_v12 }
 0xa0d   : > { %v4221_v37 = vpop.eup %4220 }
 0xa0e   : > { %v3283_v10 = vmul.f32 %v4221_v37, %v3275_v6 }
 0xa10   : > { %v3290_v19 = vmul.f32 %v3710_v13, %v3283_v10 }
 0xa12   : > { %v3297_v20 = vadd.f32 %v3711_v18, %v3290_v19 }
 0xa14   : > { %3298 = vst.msk [vmem:[%s4539_s1] sm:$0xff] %vm676_vm2, %v3297_v20 }
 0xa15   : > { %4235 = shalt.err (!%p4232_p8)
}
 0xa16   : > { %s4236_s3 = scalar_lea.hbm %s3311_s28, 128  ;;  %s4240_s23 = scalar_lea.hbm %s5054_s24, 256 }
 0xa17   : > { %p4237_p10 = scmp.ne.s32.totalorder %s3311_s28, %s4236_s3  ;;  %p4241_p13 = scmp.lt.s32.totalorder %s3311_s28, %s5054_s24 }
 0xa18   : > { %p4242_p0 = scmp.lt.s32.totalorder %s4240_s23, %s4236_s3 }
 0xa19   : > { %p4238_p11 = pnand %p4237_p10, %p4453_p3 }
 0xa1a   : > { %p4243_p1 = por %p4242_p0, %p4241_p13 }
 0xa1b   : > { %p4239_p12 = pneg %p4238_p11 }
 0xa1d   : > { %p4244_p2 = pnand %p4243_p1, %p4239_p12 }
 0xa1f   : > { %4247 = shalt.err (!%p4244_p2)
}
 0xa20   : > { %3982 = dma.vmem_to_hbm [thread:$0]  (%p4453_p3), %s3314_s21, 128, %s3311_s28, %s3300_s22  }
 0xa21 PF: > { %s5056_s20 = sld [smem:[#allocation12_spill]] }
 0xa22   : > { %s5057_s0 = sld [smem:[#allocation5_spill]] }
 0xa27   : > { %p3988_p4 = scmp.ge.s32.totalorder %s5056_s20, 2 }
 0xa28   : > { %s3325_s14 = sand.u32 1, %s5057_s0  }
 0xa29   : > { %p3985_p5 = pnand %p3988_p4, %p4463_p9  ;;  %s3326_s29 = scalar_lea.sflag [#allocation3], %s3325_s14 }
 0xa2b   : > { %p3986_p6 = pneg %p3985_p5 }
 0xa2d   : > { %4281 = dma.done.wait (%p3986_p6), %s3326_s29, 128  }
 0xa2e   : > { %4283 = vsyncadd (%p3986_p6), %s3326_s29, 4294967168  ;;  %s26_s15 = sadd.s32 1, %s5056_s20   ;;  %s5059_s25 = sld [smem:[#allocation6_spill]] }
 0xa2f   : > { %p23_p7 = scmp.ge.s32.totalorder %s26_s15, 6   ;;  %s5060_s26 = sld [smem:[#allocation7_spill]] }
 0xa30   : > { %s5061_s27 = sld [smem:[#allocation17_spill]] }
 0xa31   : > { %s5062_s28 = sld [smem:[#allocation10_spill]]  ;;  %25 = sbr.rel (!%p23_p7) target bundleno = 12 (0xc), region = 147 }
 0xa32   : > { %s5063_s29 = sld [smem:[#allocation11_spill]] }
 0xa33   : > { %s5064_s30 = sld [smem:[#allocation13_spill]] }
 0xa34   : > { %s5065_s14 = sld [smem:[#allocation15_spill]] }
 0xa36   :  { %3331 = vsyncpa [#allocation3], 1 }
 0xa37   :  { %3333 = vsyncpa [#allocation3 + $0x1], 1 }

</bundles_post_ra>
